<compile_context>
chip_gen: v7x
topology: tpu7x:2x2x1
jax: 0.10.0
libtpu: 0.0.40
codegen_flags: <defaults>
</compile_context>

<pallas_src>
import functools
import math

import jax
import jax.numpy as jnp
from jax import lax
from jax.experimental import pallas as pl
from jax.experimental.pallas import tpu as pltpu


def _layernorm(x, gamma, beta, eps=1e-5):
    mean = jnp.mean(x, axis=-1, keepdims=True)
    xc = x - mean
    var = jnp.mean(xc * xc, axis=-1, keepdims=True)
    return xc * lax.rsqrt(var + eps) * gamma + beta


def _erf(x):
    # Abramowitz & Stegun 7.1.26 (max abs error ~1.5e-7): abs/exp/mul/add/div/
    # select only — all lower cleanly on the TPU VPU/EUP.
    p = 0.3275911
    a1, a2, a3, a4, a5 = (0.254829592, -0.284496736, 1.421413741,
                          -1.453152027, 1.061405429)
    ax = jnp.abs(x)
    t = 1.0 / (1.0 + p * ax)
    poly = ((((a5 * t + a4) * t + a3) * t + a2) * t + a1) * t
    y = 1.0 - poly * jnp.exp(-ax * ax)
    return jnp.where(x >= 0, y, -y)


def _gelu(x):
    # Exact (erf-based) GELU, matching PyTorch nn.GELU() default.
    return 0.5 * x * (1.0 + _erf(x * (2.0 ** -0.5)))


def _decoder_kernel(q_ref, k_ref, v_ref, skip_ref,
                    w_in_ref, wo_ref, w1_ref, w2_ref, pv_ref, b1_ref,
                    o_ref, *, num_heads):
    L, BB, E = q_ref.shape
    S = k_ref.shape[0]
    H = num_heads
    hd = E // H
    G = BB * H
    R = L * BB

    # x (rows, K) . W (N, K) -> (rows, N)   ==  x @ W^T  (PyTorch weight layout)
    dn_nt = (((1,), (1,)), ((), ()))

    xq = q_ref[...].reshape(R, E)
    xk = k_ref[...].reshape(S * BB, E)
    xv = v_ref[...].reshape(S * BB, E)

    # --- QKV projections (Wq / bq already carry the 1/sqrt(hd) scale) ---------
    q = lax.dot_general(xq, w_in_ref[0:E, :], dn_nt,
                        preferred_element_type=jnp.float32) + pv_ref[0:1, :]
    k = lax.dot_general(xk, w_in_ref[E:2 * E, :], dn_nt,
                        preferred_element_type=jnp.float32) + pv_ref[1:2, :]
    v = lax.dot_general(xv, w_in_ref[2 * E:3 * E, :], dn_nt,
                        preferred_element_type=jnp.float32) + pv_ref[2:3, :]

    # --- multi-head attention: (batch*heads) as one leading batch dim ---------
    qg = q.reshape(L, BB, H, hd).transpose(1, 2, 0, 3).reshape(G, L, hd)
    kg = k.reshape(S, BB, H, hd).transpose(1, 2, 0, 3).reshape(G, S, hd)
    vg = v.reshape(S, BB, H, hd).transpose(1, 2, 0, 3).reshape(G, S, hd)

    s = jnp.einsum('gld,gsd->gls', qg, kg, preferred_element_type=jnp.float32)
    s = s - jnp.max(s, axis=-1, keepdims=True)
    p = jnp.exp(s)
    p = p * pl.reciprocal(jnp.sum(p, axis=-1, keepdims=True), approx=True)
    # TODO(synk): attention-weight / output dropout and attention masks are not
    # implemented — the module is used here in eval mode and passes no mask.
    ctx = jnp.einsum('gls,gsd->gld', p, vg, preferred_element_type=jnp.float32)
    ctx = ctx.reshape(BB, H, L, hd).transpose(2, 0, 1, 3).reshape(R, E)

    attn_out = lax.dot_general(ctx, wo_ref[...], dn_nt,
                               preferred_element_type=jnp.float32) + pv_ref[3:4, :]

    # --- residual + LayerNorm1 ------------------------------------------------
    h1 = _layernorm(attn_out + skip_ref[...].reshape(R, E),
                    pv_ref[4:5, :], pv_ref[5:6, :])

    # --- feed-forward: Linear -> exact-erf GELU -> Linear ---------------------
    ff = lax.dot_general(h1, w1_ref[...], dn_nt,
                         preferred_element_type=jnp.float32) + b1_ref[...]
    ff = _gelu(ff)
    ff = lax.dot_general(ff, w2_ref[...], dn_nt,
                         preferred_element_type=jnp.float32) + pv_ref[8:9, :]

    # --- residual + LayerNorm2, store in (L, BB, E) ----------------------------
    out = _layernorm(ff + h1, pv_ref[6:7, :], pv_ref[7:8, :])
    o_ref[...] = out.reshape(L, BB, E).astype(o_ref.dtype)


@functools.partial(jax.jit, static_argnames=("num_heads", "batch_block"))
def transformer_decoder(value, key, query, skip_connection, params, *,
                        num_heads, batch_block=None):
    """value/key: (S, B, E); query/skip: (L, B, E). Returns (L, B, E)."""
    S, B, E = value.shape
    L = query.shape[0]
    F = params["w1"].shape[0]
    H = num_heads
    hd = E // H
    scale = 1.0 / math.sqrt(hd)

    # Batch block: default = whole batch (fewest grid steps, contiguous DMA).
    # For large B, pass a multiple of 8 that divides B to re-enable pipelining /
    # megacore sharding across the (nb,) "parallel" grid.
    BB = B if batch_block is None else batch_block
    if B % BB != 0 or not (BB == B or BB % 8 == 0):
        raise ValueError("batch_block must divide B and be B or a multiple of 8")
    nb = B // BB

    # Only tiny vectors are touched wrapper-side (scale folding + packing);
    # all big weights are passed in their native PyTorch (out, in) layout.
    w_in = params["in_proj_weight"]                                  # (3E, E)
    b_in = params["in_proj_bias"]                                    # (3E,)
    w_in = jnp.concatenate([w_in[:E] * scale, w_in[E:]], axis=0)     # fold scale
    pv = jnp.stack([
        b_in[:E] * scale,            # 0: bq (scale folded)
        b_in[E:2 * E],               # 1: bk
        b_in[2 * E:],                # 2: bv
        params["out_proj_bias"],     # 3: bo
        params["ln1_weight"],        # 4: LN1 gamma
        params["ln1_bias"],          # 5: LN1 beta
        params["ln2_weight"],        # 6: LN2 gamma
        params["ln2_bias"],          # 7: LN2 beta
        params["b2"],                # 8: FFN second bias
    ], axis=0)                                                       # (9, E)
    b1 = params["b1"].reshape(1, F)

    rows = BB * L
    flops = nb * (2 * rows * E * E + 4 * BB * S * E * E   # QKV projections
                  + 4 * BB * L * S * E                    # scores + context
                  + 2 * rows * E * E                      # output projection
                  + 4 * rows * E * F)                     # FFN
    transcendentals = nb * (BB * H * L * S + rows * F + 2 * rows)
    bytes_accessed = 4 * (2 * query.size + key.size + value.size
                          + skip_connection.size
                          + 4 * E * E + 2 * E * F + 9 * E + F)

    act = lambda seq: pl.BlockSpec((seq, BB, E), lambda b: (0, b, 0))
    const2 = lambda shp: pl.BlockSpec(shp, lambda b: (0, 0))

    out = pl.pallas_call(
        functools.partial(_decoder_kernel, num_heads=num_heads),
        out_shape=jax.ShapeDtypeStruct((L, B, E), query.dtype),
        grid_spec=pltpu.PrefetchScalarGridSpec(
            num_scalar_prefetch=0,
            grid=(nb,),
            in_specs=[
                act(L),                    # query  (L, B, E)
                act(S),                    # key    (S, B, E)
                act(S),                    # value  (S, B, E)
                act(L),                    # skip   (L, B, E)
                const2((3 * E, E)),        # packed in-proj weight (Wq|Wk|Wv)
                const2((E, E)),            # out-proj weight
                const2((F, E)),            # FFN W1
                const2((E, F)),            # FFN W2
                const2((9, E)),            # packed bias / LayerNorm slab
                const2((1, F)),            # FFN b1
            ],
            out_specs=pl.BlockSpec((L, BB, E), lambda b: (0, b, 0)),
        ),
        compiler_params=pltpu.CompilerParams(
            dimension_semantics=("parallel",)),
        cost_estimate=pl.CostEstimate(
            flops=flops, transcendentals=transcendentals,
            bytes_accessed=bytes_accessed),
    )(query, key, value, skip_connection,
      w_in, params["out_proj_weight"], params["w1"], params["w2"], pv, b1)

    return out


def _reference(value, key, query, skip, params, num_heads):
    """Pure-JAX reference mirroring the PyTorch forward (eval mode)."""
    E = query.shape[-1]
    hd = E // num_heads
    scale = 1.0 / math.sqrt(hd)
    w_in, b_in = params["in_proj_weight"], params["in_proj_bias"]
    q = jnp.einsum('lbe,fe->lbf', query, w_in[:E]) + b_in[:E]
    k = jnp.einsum('sbe,fe->sbf', key, w_in[E:2 * E]) + b_in[E:2 * E]
    v = jnp.einsum('sbe,fe->sbf', value, w_in[2 * E:]) + b_in[2 * E:]
    L, B, _ = q.shape
    S = k.shape[0]
    qh = q.reshape(L, B, num_heads, hd).transpose(1, 2, 0, 3)       # (B,H,L,hd)
    kh = k.reshape(S, B, num_heads, hd).transpose(1, 2, 0, 3)
    vh = v.reshape(S, B, num_heads, hd).transpose(1, 2, 0, 3)
    attn = jax.nn.softmax(jnp.einsum('bhld,bhsd->bhls', qh, kh) * scale, axis=-1)
    ctx = jnp.einsum('bhls,bhsd->bhld', attn, vh)
    ctx = ctx.transpose(2, 0, 1, 3).reshape(L, B, E)
    attn_out = (jnp.einsum('lbe,fe->lbf', ctx, params["out_proj_weight"])
                + params["out_proj_bias"])

    def ln(x, g, b):
        m = jnp.mean(x, -1, keepdims=True)
        var = jnp.mean((x - m) ** 2, -1, keepdims=True)
        return (x - m) / jnp.sqrt(var + 1e-5) * g + b

    h1 = ln(attn_out + skip, params["ln1_weight"], params["ln1_bias"])
    ff = jnp.einsum('lbe,fe->lbf', h1, params["w1"]) + params["b1"]
    ff = jax.nn.gelu(ff, approximate=False)
    ff = jnp.einsum('lbf,ef->lbe', ff, params["w2"]) + params["b2"]
    return ln(ff + h1, params["ln2_weight"], params["ln2_bias"])


if __name__ == "__main__":
    # Small shapes consistent with the module:
    # feature_size=32, heads=4, forward_expansion=4, seq=8, batch=2.
    L, S, B = 8, 8, 2
    E, HEADS, FEXP = 32, 4, 4
    F = FEXP * E

    key0 = jax.random.PRNGKey(0)
    ks = jax.random.split(key0, 16)
    query = jax.random.normal(ks[0], (L, B, E), dtype=jnp.float32)
    key_in = jax.random.normal(ks[1], (S, B, E), dtype=jnp.float32)
    value = jax.random.normal(ks[2], (S, B, E), dtype=jnp.float32)
    skip = jax.random.normal(ks[3], (L, B, E), dtype=jnp.float32)

    params = dict(
        in_proj_weight=jax.random.normal(ks[4], (3 * E, E), jnp.float32) * 0.1,
        in_proj_bias=jax.random.normal(ks[5], (3 * E,), jnp.float32) * 0.05,
        out_proj_weight=jax.random.normal(ks[6], (E, E), jnp.float32) * 0.1,
        out_proj_bias=jax.random.normal(ks[7], (E,), jnp.float32) * 0.05,
        ln1_weight=1.0 + 0.1 * jax.random.normal(ks[8], (E,), jnp.float32),
        ln1_bias=0.05 * jax.random.normal(ks[9], (E,), jnp.float32),
        w1=jax.random.normal(ks[10], (F, E), jnp.float32) * 0.1,
        b1=jax.random.normal(ks[11], (F,), jnp.float32) * 0.05,
        w2=jax.random.normal(ks[12], (E, F), jnp.float32) * 0.1,
        b2=jax.random.normal(ks[13], (E,), jnp.float32) * 0.05,
        ln2_weight=1.0 + 0.1 * jax.random.normal(ks[14], (E,), jnp.float32),
        ln2_bias=0.05 * jax.random.normal(ks[15], (E,), jnp.float32),
    )

    out = transformer_decoder(value, key_in, query, skip, params, num_heads=HEADS)
    out = jax.block_until_ready(out)

    ref = _reference(value, key_in, query, skip, params, HEADS)
    assert out.shape == (L, B, E)
    # Tolerance accounts for the EUP approximate reciprocal in the softmax
    # normalization and the A&S erf polynomial in the exact-erf GELU.
    assert jnp.allclose(out, ref, atol=2e-3, rtol=2e-3), "mismatch vs reference"

    print("KERNEL_OK")
</pallas_src>

<mosaic_0001>
module attributes {stable_mosaic.version = 11 : i64} {
  func.func @_decoder_kernel(%arg0: i32, %arg1: memref<8x2x32xf32, #tpu.memory_space<vmem>>, %arg2: memref<8x2x32xf32, #tpu.memory_space<vmem>>, %arg3: memref<8x2x32xf32, #tpu.memory_space<vmem>>, %arg4: memref<8x2x32xf32, #tpu.memory_space<vmem>>, %arg5: memref<96x32xf32, #tpu.memory_space<vmem>>, %arg6: memref<32x32xf32, #tpu.memory_space<vmem>>, %arg7: memref<128x32xf32, #tpu.memory_space<vmem>>, %arg8: memref<32x128xf32, #tpu.memory_space<vmem>>, %arg9: memref<9x32xf32, #tpu.memory_space<vmem>>, %arg10: memref<1x128xf32, #tpu.memory_space<vmem>>, %arg11: memref<8x2x32xf32, #tpu.memory_space<vmem>>) attributes {dimension_semantics = [#tpu.dimension_semantics<parallel>], iteration_bounds = array<i64: 1>, scalar_prefetch = 0 : i64, scratch_operands = 0 : i64, tpu.core_type = #tpu.core_type<tc>, window_params = [{transform_indices = @transform_0, window_bounds = array<i64: 8, 2, 32>}, {transform_indices = @transform_1, window_bounds = array<i64: 8, 2, 32>}, {transform_indices = @transform_2, window_bounds = array<i64: 8, 2, 32>}, {transform_indices = @transform_3, window_bounds = array<i64: 8, 2, 32>}, {pipeline_mode = #tpu.pipeline_mode<synchronous>, transform_indices = @transform_4, window_bounds = array<i64: 96, 32>}, {pipeline_mode = #tpu.pipeline_mode<synchronous>, transform_indices = @transform_5, window_bounds = array<i64: 32, 32>}, {pipeline_mode = #tpu.pipeline_mode<synchronous>, transform_indices = @transform_6, window_bounds = array<i64: 128, 32>}, {pipeline_mode = #tpu.pipeline_mode<synchronous>, transform_indices = @transform_7, window_bounds = array<i64: 32, 128>}, {pipeline_mode = #tpu.pipeline_mode<synchronous>, transform_indices = @transform_8, window_bounds = array<i64: 9, 32>}, {pipeline_mode = #tpu.pipeline_mode<synchronous>, transform_indices = @transform_9, window_bounds = array<i64: 1, 128>}, {transform_indices = @transform_10, window_bounds = array<i64: 8, 2, 32>}]} {
    %c0 = arith.constant 0 : index
    %c0_0 = arith.constant 0 : index
    %c0_1 = arith.constant 0 : index
    %0 = vector.load %arg1[%c0, %c0_0, %c0_1] : memref<8x2x32xf32, #tpu.memory_space<vmem>>, vector<8x2x32xf32>
    %1 = vector.shape_cast %0 : vector<8x2x32xf32> to vector<16x32xf32>
    %c0_2 = arith.constant 0 : index
    %c0_3 = arith.constant 0 : index
    %c0_4 = arith.constant 0 : index
    %2 = vector.load %arg2[%c0_2, %c0_3, %c0_4] : memref<8x2x32xf32, #tpu.memory_space<vmem>>, vector<8x2x32xf32>
    %3 = vector.shape_cast %2 : vector<8x2x32xf32> to vector<16x32xf32>
    %c0_5 = arith.constant 0 : index
    %c0_6 = arith.constant 0 : index
    %c0_7 = arith.constant 0 : index
    %4 = vector.load %arg3[%c0_5, %c0_6, %c0_7] : memref<8x2x32xf32, #tpu.memory_space<vmem>>, vector<8x2x32xf32>
    %5 = vector.shape_cast %4 : vector<8x2x32xf32> to vector<16x32xf32>
    %c0_8 = arith.constant 0 : index
    %c0_9 = arith.constant 0 : index
    %6 = vector.load %arg5[%c0_8, %c0_9] : memref<96x32xf32, #tpu.memory_space<vmem>>, vector<32x32xf32>
    %cst = arith.constant dense<0.000000e+00> : vector<16x32xf32>
    %7 = tpu.matmul %1, %6, %cst {dimension_numbers = #tpu.dot_dimension_numbers<[1], [1], [0], [0], [0, 0, 1, 0], [], []>} : vector<16x32xf32>, vector<32x32xf32>, vector<16x32xf32> -> vector<16x32xf32>
    %c0_10 = arith.constant 0 : index
    %c0_11 = arith.constant 0 : index
    %8 = vector.load %arg9[%c0_10, %c0_11] : memref<9x32xf32, #tpu.memory_space<vmem>>, vector<1x32xf32>
    %9 = vector.broadcast %8 : vector<1x32xf32> to vector<16x32xf32>
    %10 = arith.addf %7, %9 : vector<16x32xf32>
    %c32 = arith.constant 32 : index
    %c0_12 = arith.constant 0 : index
    %11 = vector.load %arg5[%c32, %c0_12] : memref<96x32xf32, #tpu.memory_space<vmem>>, vector<32x32xf32>
    %cst_13 = arith.constant dense<0.000000e+00> : vector<16x32xf32>
    %12 = tpu.matmul %3, %11, %cst_13 {dimension_numbers = #tpu.dot_dimension_numbers<[1], [1], [0], [0], [0, 0, 1, 0], [], []>} : vector<16x32xf32>, vector<32x32xf32>, vector<16x32xf32> -> vector<16x32xf32>
    %c1 = arith.constant 1 : index
    %c0_14 = arith.constant 0 : index
    %13 = vector.load %arg9[%c1, %c0_14] : memref<9x32xf32, #tpu.memory_space<vmem>>, vector<1x32xf32>
    %14 = vector.broadcast %13 : vector<1x32xf32> to vector<16x32xf32>
    %15 = arith.addf %12, %14 : vector<16x32xf32>
    %c64 = arith.constant 64 : index
    %c0_15 = arith.constant 0 : index
    %16 = vector.load %arg5[%c64, %c0_15] : memref<96x32xf32, #tpu.memory_space<vmem>>, vector<32x32xf32>
    %cst_16 = arith.constant dense<0.000000e+00> : vector<16x32xf32>
    %17 = tpu.matmul %5, %16, %cst_16 {dimension_numbers = #tpu.dot_dimension_numbers<[1], [1], [0], [0], [0, 0, 1, 0], [], []>} : vector<16x32xf32>, vector<32x32xf32>, vector<16x32xf32> -> vector<16x32xf32>
    %c2 = arith.constant 2 : index
    %c0_17 = arith.constant 0 : index
    %18 = vector.load %arg9[%c2, %c0_17] : memref<9x32xf32, #tpu.memory_space<vmem>>, vector<1x32xf32>
    %19 = vector.broadcast %18 : vector<1x32xf32> to vector<16x32xf32>
    %20 = arith.addf %17, %19 : vector<16x32xf32>
    %21 = vector.shape_cast %10 : vector<16x32xf32> to vector<8x2x4x8xf32>
    %22 = tpu.transpose %21, [1, 2, 0, 3] : vector<8x2x4x8xf32> -> vector<2x4x8x8xf32>
    %23 = vector.shape_cast %22 : vector<2x4x8x8xf32> to vector<8x8x8xf32>
    %24 = vector.shape_cast %15 : vector<16x32xf32> to vector<8x2x4x8xf32>
    %25 = tpu.transpose %24, [1, 2, 0, 3] : vector<8x2x4x8xf32> -> vector<2x4x8x8xf32>
    %26 = vector.shape_cast %25 : vector<2x4x8x8xf32> to vector<8x8x8xf32>
    %27 = vector.shape_cast %20 : vector<16x32xf32> to vector<8x2x4x8xf32>
    %28 = tpu.transpose %27, [1, 2, 0, 3] : vector<8x2x4x8xf32> -> vector<2x4x8x8xf32>
    %29 = vector.shape_cast %28 : vector<2x4x8x8xf32> to vector<8x8x8xf32>
    "tpu.trace_start"() <{level = 10 : i32, message = "gld,gsd->gls"}> : () -> ()
    %cst_18 = arith.constant dense<0.000000e+00> : vector<8x8x8xf32>
    %30 = tpu.matmul %23, %26, %cst_18 {dimension_numbers = #tpu.dot_dimension_numbers<[2], [2], [1], [1], [0, 0, 0, 1, 1, 1], [0], [0]>} : vector<8x8x8xf32>, vector<8x8x8xf32>, vector<8x8x8xf32> -> vector<8x8x8xf32>
    "tpu.trace_stop"() : () -> ()
    %cst_19 = arith.constant dense<0xFF800000> : vector<8x8xf32>
    %31 = vector.multi_reduction <maximumf>, %30, %cst_19 [2] : vector<8x8x8xf32> to vector<8x8xf32>
    %32 = vector.shape_cast %31 : vector<8x8xf32> to vector<8x8x1xf32>
    %33 = vector.broadcast %32 : vector<8x8x1xf32> to vector<8x8x8xf32>
    %34 = arith.subf %30, %33 : vector<8x8x8xf32>
    %35 = math.exp %34 : vector<8x8x8xf32>
    %cst_20 = arith.constant dense<0.000000e+00> : vector<8x8xf32>
    %36 = vector.multi_reduction <add>, %35, %cst_20 [2] : vector<8x8x8xf32> to vector<8x8xf32>
    %37 = vector.shape_cast %36 : vector<8x8xf32> to vector<8x8x1xf32>
    %38 = tpu.reciprocal %37 {approx = true} : vector<8x8x1xf32> -> vector<8x8x1xf32>
    %39 = vector.broadcast %38 : vector<8x8x1xf32> to vector<8x8x8xf32>
    %40 = arith.mulf %35, %39 : vector<8x8x8xf32>
    "tpu.trace_start"() <{level = 10 : i32, message = "gls,gsd->gld"}> : () -> ()
    %cst_21 = arith.constant dense<0.000000e+00> : vector<8x8x8xf32>
    %41 = tpu.matmul %40, %29, %cst_21 {dimension_numbers = #tpu.dot_dimension_numbers<[2], [1], [1], [2], [0, 0, 0, 1, 1, 2], [0], [0]>} : vector<8x8x8xf32>, vector<8x8x8xf32>, vector<8x8x8xf32> -> vector<8x8x8xf32>
    "tpu.trace_stop"() : () -> ()
    %42 = vector.shape_cast %41 : vector<8x8x8xf32> to vector<2x4x8x8xf32>
    %43 = tpu.transpose %42, [2, 0, 1, 3] : vector<2x4x8x8xf32> -> vector<8x2x4x8xf32>
    %44 = vector.shape_cast %43 : vector<8x2x4x8xf32> to vector<16x32xf32>
    %c0_22 = arith.constant 0 : index
    %c0_23 = arith.constant 0 : index
    %45 = vector.load %arg6[%c0_22, %c0_23] : memref<32x32xf32, #tpu.memory_space<vmem>>, vector<32x32xf32>
    %cst_24 = arith.constant dense<0.000000e+00> : vector<16x32xf32>
    %46 = tpu.matmul %44, %45, %cst_24 {dimension_numbers = #tpu.dot_dimension_numbers<[1], [1], [0], [0], [0, 0, 1, 0], [], []>} : vector<16x32xf32>, vector<32x32xf32>, vector<16x32xf32> -> vector<16x32xf32>
    %c3 = arith.constant 3 : index
    %c0_25 = arith.constant 0 : index
    %47 = vector.load %arg9[%c3, %c0_25] : memref<9x32xf32, #tpu.memory_space<vmem>>, vector<1x32xf32>
    %48 = vector.broadcast %47 : vector<1x32xf32> to vector<16x32xf32>
    %49 = arith.addf %46, %48 : vector<16x32xf32>
    %c0_26 = arith.constant 0 : index
    %c0_27 = arith.constant 0 : index
    %c0_28 = arith.constant 0 : index
    %50 = vector.load %arg4[%c0_26, %c0_27, %c0_28] : memref<8x2x32xf32, #tpu.memory_space<vmem>>, vector<8x2x32xf32>
    %51 = vector.shape_cast %50 : vector<8x2x32xf32> to vector<16x32xf32>
    %52 = arith.addf %49, %51 : vector<16x32xf32>
    %c4 = arith.constant 4 : index
    %c0_29 = arith.constant 0 : index
    %53 = vector.load %arg9[%c4, %c0_29] : memref<9x32xf32, #tpu.memory_space<vmem>>, vector<1x32xf32>
    %c5 = arith.constant 5 : index
    %c0_30 = arith.constant 0 : index
    %54 = vector.load %arg9[%c5, %c0_30] : memref<9x32xf32, #tpu.memory_space<vmem>>, vector<1x32xf32>
    %cst_31 = arith.constant dense<0.000000e+00> : vector<16xf32>
    %55 = vector.multi_reduction <add>, %52, %cst_31 [1] : vector<16x32xf32> to vector<16xf32>
    %56 = vector.shape_cast %55 : vector<16xf32> to vector<16x1xf32>
    %cst_32 = arith.constant 3.200000e+01 : f32
    %57 = vector.broadcast %cst_32 : f32 to vector<16x1xf32>
    %58 = arith.divf %56, %57 : vector<16x1xf32>
    %59 = vector.broadcast %58 : vector<16x1xf32> to vector<16x32xf32>
    %60 = arith.subf %52, %59 : vector<16x32xf32>
    %61 = arith.mulf %60, %60 : vector<16x32xf32>
    %cst_33 = arith.constant dense<0.000000e+00> : vector<16xf32>
    %62 = vector.multi_reduction <add>, %61, %cst_33 [1] : vector<16x32xf32> to vector<16xf32>
    %63 = vector.shape_cast %62 : vector<16xf32> to vector<16x1xf32>
    %cst_34 = arith.constant 3.200000e+01 : f32
    %64 = vector.broadcast %cst_34 : f32 to vector<16x1xf32>
    %65 = arith.divf %63, %64 : vector<16x1xf32>
    %cst_35 = arith.constant 9.99999974E-6 : f32
    %66 = vector.broadcast %cst_35 : f32 to vector<16x1xf32>
    %67 = arith.addf %65, %66 : vector<16x1xf32>
    %68 = math.rsqrt %67 : vector<16x1xf32>
    %69 = vector.broadcast %68 : vector<16x1xf32> to vector<16x32xf32>
    %70 = arith.mulf %60, %69 : vector<16x32xf32>
    %71 = vector.broadcast %53 : vector<1x32xf32> to vector<16x32xf32>
    %72 = arith.mulf %70, %71 : vector<16x32xf32>
    %73 = vector.broadcast %54 : vector<1x32xf32> to vector<16x32xf32>
    %74 = arith.addf %72, %73 : vector<16x32xf32>
    %c0_36 = arith.constant 0 : index
    %c0_37 = arith.constant 0 : index
    %75 = vector.load %arg7[%c0_36, %c0_37] : memref<128x32xf32, #tpu.memory_space<vmem>>, vector<128x32xf32>
    %cst_38 = arith.constant dense<0.000000e+00> : vector<16x128xf32>
    %76 = tpu.matmul %74, %75, %cst_38 {dimension_numbers = #tpu.dot_dimension_numbers<[1], [1], [0], [0], [0, 0, 1, 0], [], []>} : vector<16x32xf32>, vector<128x32xf32>, vector<16x128xf32> -> vector<16x128xf32>
    %c0_39 = arith.constant 0 : index
    %c0_40 = arith.constant 0 : index
    %77 = vector.load %arg10[%c0_39, %c0_40] : memref<1x128xf32, #tpu.memory_space<vmem>>, vector<1x128xf32>
    %78 = vector.broadcast %77 : vector<1x128xf32> to vector<16x128xf32>
    %79 = arith.addf %76, %78 : vector<16x128xf32>
    %cst_41 = arith.constant 5.000000e-01 : f32
    %80 = vector.broadcast %cst_41 : f32 to vector<16x128xf32>
    %81 = arith.mulf %80, %79 : vector<16x128xf32>
    %cst_42 = arith.constant 0.707106769 : f32
    %82 = vector.broadcast %cst_42 : f32 to vector<16x128xf32>
    %83 = arith.mulf %79, %82 : vector<16x128xf32>
    %84 = math.absf %83 : vector<16x128xf32>
    %cst_43 = arith.constant 0.327591091 : f32
    %85 = vector.broadcast %cst_43 : f32 to vector<16x128xf32>
    %86 = arith.mulf %85, %84 : vector<16x128xf32>
    %cst_44 = arith.constant 1.000000e+00 : f32
    %87 = vector.broadcast %cst_44 : f32 to vector<16x128xf32>
    %88 = arith.addf %87, %86 : vector<16x128xf32>
    %cst_45 = arith.constant 1.000000e+00 : f32
    %89 = vector.broadcast %cst_45 : f32 to vector<16x128xf32>
    %90 = arith.divf %89, %88 : vector<16x128xf32>
    %cst_46 = arith.constant 1.06140542 : f32
    %91 = vector.broadcast %cst_46 : f32 to vector<16x128xf32>
    %92 = arith.mulf %91, %90 : vector<16x128xf32>
    %cst_47 = arith.constant -1.45315206 : f32
    %93 = vector.broadcast %cst_47 : f32 to vector<16x128xf32>
    %94 = arith.addf %92, %93 : vector<16x128xf32>
    %95 = arith.mulf %94, %90 : vector<16x128xf32>
    %cst_48 = arith.constant 1.42141378 : f32
    %96 = vector.broadcast %cst_48 : f32 to vector<16x128xf32>
    %97 = arith.addf %95, %96 : vector<16x128xf32>
    %98 = arith.mulf %97, %90 : vector<16x128xf32>
    %cst_49 = arith.constant -0.284496725 : f32
    %99 = vector.broadcast %cst_49 : f32 to vector<16x128xf32>
    %100 = arith.addf %98, %99 : vector<16x128xf32>
    %101 = arith.mulf %100, %90 : vector<16x128xf32>
    %cst_50 = arith.constant 0.254829586 : f32
    %102 = vector.broadcast %cst_50 : f32 to vector<16x128xf32>
    %103 = arith.addf %101, %102 : vector<16x128xf32>
    %104 = arith.mulf %103, %90 : vector<16x128xf32>
    %cst_51 = arith.constant 0.000000e+00 : f32
    %105 = vector.broadcast %cst_51 : f32 to vector<16x128xf32>
    %106 = arith.subf %105, %84 : vector<16x128xf32>
    %107 = arith.mulf %106, %84 : vector<16x128xf32>
    %108 = math.exp %107 : vector<16x128xf32>
    %109 = arith.mulf %104, %108 : vector<16x128xf32>
    %cst_52 = arith.constant 1.000000e+00 : f32
    %110 = vector.broadcast %cst_52 : f32 to vector<16x128xf32>
    %111 = arith.subf %110, %109 : vector<16x128xf32>
    %cst_53 = arith.constant 0.000000e+00 : f32
    %112 = vector.broadcast %cst_53 : f32 to vector<16x128xf32>
    %113 = arith.cmpf oge, %83, %112 : vector<16x128xf32>
    %cst_54 = arith.constant 0.000000e+00 : f32
    %114 = vector.broadcast %cst_54 : f32 to vector<16x128xf32>
    %115 = arith.subf %114, %111 : vector<16x128xf32>
    %116 = arith.select %113, %111, %115 : vector<16x128xi1>, vector<16x128xf32>
    %cst_55 = arith.constant 1.000000e+00 : f32
    %117 = vector.broadcast %cst_55 : f32 to vector<16x128xf32>
    %118 = arith.addf %117, %116 : vector<16x128xf32>
    %119 = arith.mulf %81, %118 : vector<16x128xf32>
    %c0_56 = arith.constant 0 : index
    %c0_57 = arith.constant 0 : index
    %120 = vector.load %arg8[%c0_56, %c0_57] : memref<32x128xf32, #tpu.memory_space<vmem>>, vector<32x128xf32>
    %cst_58 = arith.constant dense<0.000000e+00> : vector<16x32xf32>
    %121 = tpu.matmul %119, %120, %cst_58 {dimension_numbers = #tpu.dot_dimension_numbers<[1], [1], [0], [0], [0, 0, 1, 0], [], []>} : vector<16x128xf32>, vector<32x128xf32>, vector<16x32xf32> -> vector<16x32xf32>
    %c8 = arith.constant 8 : index
    %c0_59 = arith.constant 0 : index
    %122 = vector.load %arg9[%c8, %c0_59] : memref<9x32xf32, #tpu.memory_space<vmem>>, vector<1x32xf32>
    %123 = vector.broadcast %122 : vector<1x32xf32> to vector<16x32xf32>
    %124 = arith.addf %121, %123 : vector<16x32xf32>
    %125 = arith.addf %124, %74 : vector<16x32xf32>
    %c6 = arith.constant 6 : index
    %c0_60 = arith.constant 0 : index
    %126 = vector.load %arg9[%c6, %c0_60] : memref<9x32xf32, #tpu.memory_space<vmem>>, vector<1x32xf32>
    %c7 = arith.constant 7 : index
    %c0_61 = arith.constant 0 : index
    %127 = vector.load %arg9[%c7, %c0_61] : memref<9x32xf32, #tpu.memory_space<vmem>>, vector<1x32xf32>
    %cst_62 = arith.constant dense<0.000000e+00> : vector<16xf32>
    %128 = vector.multi_reduction <add>, %125, %cst_62 [1] : vector<16x32xf32> to vector<16xf32>
    %129 = vector.shape_cast %128 : vector<16xf32> to vector<16x1xf32>
    %cst_63 = arith.constant 3.200000e+01 : f32
    %130 = vector.broadcast %cst_63 : f32 to vector<16x1xf32>
    %131 = arith.divf %129, %130 : vector<16x1xf32>
    %132 = vector.broadcast %131 : vector<16x1xf32> to vector<16x32xf32>
    %133 = arith.subf %125, %132 : vector<16x32xf32>
    %134 = arith.mulf %133, %133 : vector<16x32xf32>
    %cst_64 = arith.constant dense<0.000000e+00> : vector<16xf32>
    %135 = vector.multi_reduction <add>, %134, %cst_64 [1] : vector<16x32xf32> to vector<16xf32>
    %136 = vector.shape_cast %135 : vector<16xf32> to vector<16x1xf32>
    %cst_65 = arith.constant 3.200000e+01 : f32
    %137 = vector.broadcast %cst_65 : f32 to vector<16x1xf32>
    %138 = arith.divf %136, %137 : vector<16x1xf32>
    %cst_66 = arith.constant 9.99999974E-6 : f32
    %139 = vector.broadcast %cst_66 : f32 to vector<16x1xf32>
    %140 = arith.addf %138, %139 : vector<16x1xf32>
    %141 = math.rsqrt %140 : vector<16x1xf32>
    %142 = vector.broadcast %141 : vector<16x1xf32> to vector<16x32xf32>
    %143 = arith.mulf %133, %142 : vector<16x32xf32>
    %144 = vector.broadcast %126 : vector<1x32xf32> to vector<16x32xf32>
    %145 = arith.mulf %143, %144 : vector<16x32xf32>
    %146 = vector.broadcast %127 : vector<1x32xf32> to vector<16x32xf32>
    %147 = arith.addf %145, %146 : vector<16x32xf32>
    %148 = vector.shape_cast %147 : vector<16x32xf32> to vector<8x2x32xf32>
    %c0_67 = arith.constant 0 : index
    %c0_68 = arith.constant 0 : index
    %c0_69 = arith.constant 0 : index
    %149 = vector.load %arg11[%c0_67, %c0_68, %c0_69] : memref<8x2x32xf32, #tpu.memory_space<vmem>>, vector<8x2x32xf32>
    tpu.vector_store %arg11[%c0_67, %c0_68, %c0_69], %148 {strides = array<i32>} : memref<8x2x32xf32, #tpu.memory_space<vmem>>, vector<8x2x32xf32>,
    return
  }
  func.func @transform_0(%arg0: i32) -> (i32, i32, i32) {
    %c0_i32 = arith.constant 0 : i32
    %c0_i32_0 = arith.constant 0 : i32
    %c0_i32_1 = arith.constant 0 : i32
    return %c0_i32, %arg0, %c0_i32_0 : i32, i32, i32
  }
  func.func @transform_1(%arg0: i32) -> (i32, i32, i32) {
    %c0_i32 = arith.constant 0 : i32
    %c0_i32_0 = arith.constant 0 : i32
    %c0_i32_1 = arith.constant 0 : i32
    return %c0_i32, %arg0, %c0_i32_0 : i32, i32, i32
  }
  func.func @transform_2(%arg0: i32) -> (i32, i32, i32) {
    %c0_i32 = arith.constant 0 : i32
    %c0_i32_0 = arith.constant 0 : i32
    %c0_i32_1 = arith.constant 0 : i32
    return %c0_i32, %arg0, %c0_i32_0 : i32, i32, i32
  }
  func.func @transform_3(%arg0: i32) -> (i32, i32, i32) {
    %c0_i32 = arith.constant 0 : i32
    %c0_i32_0 = arith.constant 0 : i32
    %c0_i32_1 = arith.constant 0 : i32
    return %c0_i32, %arg0, %c0_i32_0 : i32, i32, i32
  }
  func.func @transform_4(%arg0: i32) -> (i32, i32) {
    %c0_i32 = arith.constant 0 : i32
    %c0_i32_0 = arith.constant 0 : i32
    %c0_i32_1 = arith.constant 0 : i32
    return %c0_i32, %c0_i32_0 : i32, i32
  }
  func.func @transform_5(%arg0: i32) -> (i32, i32) {
    %c0_i32 = arith.constant 0 : i32
    %c0_i32_0 = arith.constant 0 : i32
    %c0_i32_1 = arith.constant 0 : i32
    return %c0_i32, %c0_i32_0 : i32, i32
  }
  func.func @transform_6(%arg0: i32) -> (i32, i32) {
    %c0_i32 = arith.constant 0 : i32
    %c0_i32_0 = arith.constant 0 : i32
    %c0_i32_1 = arith.constant 0 : i32
    return %c0_i32, %c0_i32_0 : i32, i32
  }
  func.func @transform_7(%arg0: i32) -> (i32, i32) {
    %c0_i32 = arith.constant 0 : i32
    %c0_i32_0 = arith.constant 0 : i32
    %c0_i32_1 = arith.constant 0 : i32
    return %c0_i32, %c0_i32_0 : i32, i32
  }
  func.func @transform_8(%arg0: i32) -> (i32, i32) {
    %c0_i32 = arith.constant 0 : i32
    %c0_i32_0 = arith.constant 0 : i32
    %c0_i32_1 = arith.constant 0 : i32
    return %c0_i32, %c0_i32_0 : i32, i32
  }
  func.func @transform_9(%arg0: i32) -> (i32, i32) {
    %c0_i32 = arith.constant 0 : i32
    %c0_i32_0 = arith.constant 0 : i32
    %c0_i32_1 = arith.constant 0 : i32
    return %c0_i32, %c0_i32_0 : i32, i32
  }
  func.func @transform_10(%arg0: i32) -> (i32, i32, i32) {
    %c0_i32 = arith.constant 0 : i32
    %c0_i32_0 = arith.constant 0 : i32
    %c0_i32_1 = arith.constant 0 : i32
    return %c0_i32, %arg0, %c0_i32_0 : i32, i32, i32
  }
}

</mosaic_0001>

<bundles_post_ra>
// kernel: transformer_decoder.1
= control target key start
LH: loop header
LB: loop body
LE: loop exit
PB: predicated region body
PF: predicated region fallthrough
CT: control target
= control target key end

     0   :  { %vm111_vm0 = vcmask 261120   ;;  %v82_v3 = vlaneseq  ;;  %v4073_v8 = vmov 1983009808   ;;  %s4889_s0 = inlined_call_operand.vmem [shape: f32[8,2,32], index: 0, kind: input, shape index: {}]   ;;  %s4890_s1 = inlined_call_operand.vmem [shape: f32[8,2,32], index: 1, kind: input, shape index: {}]   ;;  %s4891_s2 = inlined_call_operand.vmem [shape: f32[8,2,32], index: 2, kind: input, shape index: {}]   ;;  %s4892_s3 = inlined_call_operand.vmem [shape: f32[8,2,32], index: 3, kind: input, shape index: {}]   ;;  %s4893_s4 = inlined_call_operand.vmem [shape: f32[96,32], index: 4, kind: input, shape index: {}]   ;;  %s4894_s5 = inlined_call_operand.vmem [shape: f32[32,32], index: 5, kind: input, shape index: {}]   ;;  %s4895_s6 = inlined_call_operand.vmem [shape: f32[128,32], index: 6, kind: input, shape index: {}]   ;;  %s4896_s7 = inlined_call_operand.vmem [shape: f32[32,128], index: 7, kind: input, shape index: {}]   ;;  %s4897_s8 = inlined_call_operand.vmem [shape: f32[9,32], index: 8, kind: input, shape index: {}]   ;;  %s4898_s9 = inlined_call_operand.vmem [shape: f32[1,128], index: 9, kind: input, shape index: {}]   ;;  %s4899_s10 = inlined_call_operand.hbm [shape: f32[8,2,32], index: 10, kind: output, shape index: {}]  }
   0x1   :  { %v60_v0 = vld [vmem:[%s4893_s4] sm:$0xff]  ;;  %v61_v1 = vld [vmem:[%s4893_s4 + $0x8] sm:$0xff]  ;;  %v62_v2 = vld [vmem:[%s4893_s4 + $0x10] sm:$0xff]  ;;  %v80_v9 = vunpack.c.l.s4 %v4073_v8 }
   0x2   :  { %v3884_v4 = vpack.c.bf16 %v61_v1, %v60_v0  ;;  %vm4152_vm1 = vmpackc.low %vm111_vm0, %vm111_vm0  ;;  %v63_v6 = vld [vmem:[%s4893_s4 + $0x18] sm:$0xff]  ;;  %v36_v7 = vld [vmem:[%s4889_s0] sm:$0x3]  ;;  %v4173_v17 = vshrl.u32 %v82_v3, 7 }
   0x3   :  { %v3890_v10 = vpack.c.bf16 %v63_v6, %v62_v2  ;;  %v37_v11 = vld [vmem:[%s4889_s0 + $0x2] sm:$0x3]  ;;  %v38_v12 = vld [vmem:[%s4889_s0 + $0x4] sm:$0x3]  ;;  %v39_v13 = vld [vmem:[%s4889_s0 + $0x6] sm:$0x3]  ;;  %v81_v16 = vunpack.c.0.s8 %v80_v9 }
   0x4   :  { %3886 = vmatprep.subr.msk.bf16.mxu0 %vm4152_vm1, %v3884_v4  ;;  %v77_v14 = vcombine.low %v36_v7, %v37_v11  ;;  %v78_v15 = vcombine.low %v38_v12, %v39_v13  ;;  %v40_v18 = vld [vmem:[%s4889_s0 + $0x8] sm:$0x3]  ;;  %v41_v19 = vld [vmem:[%s4889_s0 + $0xa] sm:$0x3]  ;;  %v42_v20 = vld [vmem:[%s4889_s0 + $0xc] sm:$0x3] }
   0x5   :  { %3889 = vmatpush3.bf16.xpose.msk.msra.mxu0 %vm4152_vm1, %v3884_v4  ;;  %v43_v21 = vld [vmem:[%s4889_s0 + $0xe] sm:$0x3]  ;;  %v4192_v22 = vsub.s32 %v81_v16, %v4173_v17  ;;  %v203_v23 = vld [vmem:[%s4893_s4 + $0x20] sm:$0xff]  ;;  %v94_v31 = vcombine.low %v40_v18, %v41_v19 }
   0x6   :  { %3892 = vmatprep.subr.msk.bf16.mxu0 %vm4152_vm1, %v3890_v10  ;;  %v204_v24 = vld [vmem:[%s4893_s4 + $0x28] sm:$0xff]  ;;  %v44_v25 = vld [vmem:[%s4890_s1] sm:$0x3]  ;;  %v45_v26 = vld [vmem:[%s4890_s1 + $0x2] sm:$0x3]  ;;  %v95_v32 = vcombine.low %v42_v20, %v43_v21 }
   0x7   :  { %v46_v27 = vld [vmem:[%s4890_s1 + $0x4] sm:$0x3]  ;;  %v47_v28 = vld [vmem:[%s4890_s1 + $0x6] sm:$0x3]  ;;  %v85_v29 = vrot.slane %v77_v14, %v4192_v22  ;;  %v92_v30 = vrot.slane %v78_v15, %v4192_v22  ;;  %v220_v33 = vcombine.low %v44_v25, %v45_v26 }
   0x8   :  { %v221_v34 = vcombine.low %v46_v27, %v47_v28 }
   0x9   :  { %15 = vsyncpa [#allocation3], 0  ;;  %v93_v35 = vcombine.low %v85_v29, %v92_v30  ;;  %v3896_v36 = vpack.c.bf16 %v204_v24, %v203_v23  ;;  %v102_v37 = vrot.slane %v94_v31, %v4192_v22  ;;  %v109_v38 = vrot.slane %v95_v32, %v4192_v22  ;;  %v205_v41 = vld [vmem:[%s4893_s4 + $0x30] sm:$0xff]  ;;  %v206_v42 = vld [vmem:[%s4893_s4 + $0x38] sm:$0xff]  ;;  %s4075_s22 = smov 112   ;;  %s4076_s28 = smov 104  }
   0xa   :  { %v228_v39 = vrot.slane %v220_v33, %v4192_v22  ;;  %v235_v40 = vrot.slane %v221_v34, %v4192_v22  ;;  %v3902_v45 = vpack.c.bf16 %v206_v42, %v205_v41  ;;  %v48_v46 = vld [vmem:[%s4890_s1 + $0x8] sm:$0x3]  ;;  %v49_v47 = vld [vmem:[%s4890_s1 + $0xa] sm:$0x3]  ;;  %v50_v48 = vld [vmem:[%s4890_s1 + $0xc] sm:$0x3] }
   0xb   :  { %3722 = vmatprep.mubr.msk.f32.mxu0 %vm111_vm0, %v93_v35  ;;  %v110_v43 = vcombine.low %v102_v37, %v109_v38  ;;  %v51_v49 = vld [vmem:[%s4890_s1 + $0xe] sm:$0x3]  ;;  %v237_v50 = vcombine.low %v48_v46, %v49_v47  ;;  %v3546_v55 = vld [vmem:[%s4897_s8] ss:$0 sm:$0xff]  ;;  %s4074_s1 = smov 120   ;;  %v347_v4 = vld [vmem:[%s4893_s4 + $0x50] sm:$0xff] }
   0xc   :  { %v236_v44 = vcombine.low %v228_v39, %v235_v40  ;;  %v238_v51 = vcombine.low %v50_v48, %v51_v49  ;;  %v345_v60 = vld [vmem:[%s4893_s4 + $0x40] sm:$0xff]  ;;  %v346_v61 = vld [vmem:[%s4893_s4 + $0x48] sm:$0xff]  ;;  %v348_v6 = vld [vmem:[%s4893_s4 + $0x58] sm:$0xff]  ;;  %v4077_v27 = vmov 0.0   ;;  %vm4078_vm2 = vmmov 0   ;;  %s4081_s15 = smov 24  }
   0xd   :  { %3895 = vmatpush3.bf16.xpose.msk.msra.mxu0 %vm4152_vm1, %v3890_v10  ;;  %v245_v52 = vrot.slane %v237_v50, %v4192_v22  ;;  %v3553_v62 = vld [vmem:[%s4897_s8 + $0x1] ss:$0 sm:$0xff]  ;;  %v3908_v63 = vpack.c.bf16 %v346_v61, %v345_v60  ;;  %v3914_v7 = vpack.c.bf16 %v348_v6, %v347_v4  ;;  %v53_v9 = vld [vmem:[%s4891_s2 + $0x2] sm:$0x3]  ;;  %v54_v10 = vld [vmem:[%s4891_s2 + $0x4] sm:$0x3]  ;;  %3747 = vmatprep.subr.mxu1 %v4077_v27 }
   0xe   :  { %3898 = vmatprep.subr.msk.bf16.mxu0 %vm4152_vm1, %v3896_v36  ;;  %v252_v53 = vrot.slane %v238_v51, %v4192_v22  ;;  %v52_v8 = vld [vmem:[%s4891_s2] sm:$0x3]  ;;  %v55_v11 = vld [vmem:[%s4891_s2 + $0x6] sm:$0x3]  ;;  %v56_v13 = vld [vmem:[%s4891_s2 + $0x8] sm:$0x3]  ;;  %3749 = vmatprep.mubr.msk.f32.mxu1 %vm4078_vm2, %v4077_v27 }
   0xf   :  { %v362_v12 = vcombine.low %v52_v8, %v53_v9  ;;  %v363_v14 = vcombine.low %v54_v10, %v55_v11  ;;  %v57_v15 = vld [vmem:[%s4891_s2 + $0xa] sm:$0x3]  ;;  %v58_v16 = vld [vmem:[%s4891_s2 + $0xc] sm:$0x3]  ;;  %v59_v18 = vld [vmem:[%s4891_s2 + $0xe] sm:$0x3] }
  0x10   :  { %v253_v54 = vcombine.low %v245_v52, %v252_v53  ;;  %v379_v20 = vcombine.low %v56_v13, %v57_v15  ;;  %v380_v21 = vcombine.low %v58_v16, %v59_v18  ;;  %v4079_v33 = vmov 1934713408   ;;  %s4082_s16 = smov 16  }
  0x11   :  { %v370_v19 = vrot.slane %v362_v12, %v4192_v22  ;;  %v377_v23 = vrot.slane %v363_v14, %v4192_v22  ;;  %v542_v34 = vunpack.c.l.s4 %v4079_v33  ;;  %vm1363_vm3 = vcmask 64512  }
  0x12   :  { %v387_v24 = vrot.slane %v379_v20, %v4192_v22  ;;  %v394_v25 = vrot.slane %v380_v21, %v4192_v22  ;;  %vm2942_vm4 = vcmask 130048   ;;  %vm2945_vm5 = vcmask 195584  }
  0x13   :  { %v378_v26 = vcombine.low %v370_v19, %v377_v23  ;;  %v543_v37 = vunpack.c.0.s8 %v542_v34  ;;  %vm3521_vm8 = vcmask 254976  }
  0x14   :  { %3723 = vmatmul.mubr.msk.f32.vlgmr.msra.gmra.mrb[0].mxu0 %vm111_vm0, %v110_v43  ;;  %v395_v28 = vcombine.low %v387_v24, %v394_v25 }
  0x15   :  { %3901 = vmatpush3.bf16.xpose.msk.msra.mxu0 %vm4152_vm1, %v3896_v36  ;;  %3733 = vmatprep.mubr.msk.f32.mxu0 %vm111_vm0, %v236_v44 }
  0x16   :  { %3904 = vmatprep.subr.msk.bf16.mxu0 %vm4152_vm1, %v3902_v45 }
  0x1d   :  { %3907 = vmatpush3.bf16.xpose.msk.msra.mxu0 %vm4152_vm1, %v3902_v45  ;;  %v4354_v45 = vsub.s32 %v543_v37, %v4173_v17 }
  0x1e   :  { %3910 = vmatprep.subr.msk.bf16.mxu0 %vm4152_vm1, %v3908_v63 }
  0x24   :  { %3734 = vmatmul.mubr.msk.f32.vlgmr.msra.gmra.mrb[2].mxu0 %vm111_vm0, %v253_v54 }
  0x25   :  { %3913 = vmatpush3.bf16.xpose.msk.msra.mxu0 %vm4152_vm1, %v3908_v63  ;;  %3744 = vmatprep.mubr.msk.f32.mxu0 %vm111_vm0, %v378_v26 }
  0x26   :  { %3916 = vmatprep.subr.msk.bf16.mxu0 %vm4152_vm1, %v3914_v7 }
  0x2d   :  { %3919 = vmatpush3.bf16.xpose.msk.msra.mxu0 %vm4152_vm1, %v3914_v7 }
  0x2e   :  { %3767 = vmatprep.subr.mxu0 %v4077_v27 }
  0x34   :  { %3745 = vmatmul.mubr.msk.f32.vlgmr.msra.gmra.mrb[4].mxu0 %vm111_vm0, %v395_v28 }
  0x35   :  { %3769 = vmatprep.mubr.msk.f32.mxu0 %vm4078_vm2, %v4077_v27 }
  0xe7   :  { %v3724_v56 = vpop.f32.mrb[0].mxu0 }
  0xe8   :  { %v4255_v57 = vadd.f32 %v3724_v56, %v3546_v55  ;;  %v194_v58 = vpop.f32.mrb[1].mxu0 }
  0xe9   :  { %v4257_v59 = vadd.f32 %v3546_v55, %v194_v58 }
  0xea   :  { %491 = vrot.lane.b32.xlu1 %v4255_v57, %s4074_s1 }
  0xeb   :  { %489 = vrot.lane.b32.xlu0 %v4257_v59, %s4074_s1 }
  0xee   :  { %497 = vrot.lane.b32.xlu1 %v4255_v57, %s4075_s22 }
  0xef   :  { %495 = vrot.lane.b32.xlu0 %v4257_v59, %s4075_s22 }
  0xf7   :  { %v3735_v0 = vpop.f32.mrb[2].mxu0 }
  0xf8   :  { %v4278_v1 = vadd.f32 %v3735_v0, %v3553_v62  ;;  %v336_v2 = vpop.f32.mrb[3].mxu0 }
  0xf9   :  { %v4286_v3 = vadd.f32 %v3553_v62, %v336_v2 }
  0xfa   :  { %789 = vrot.lane.b32.xlu1 %v4278_v1, %s4075_s22  ;;  %783 = vrot.lane.b32.xlu0 %v4278_v1, %s4074_s1 }
  0xfe   :  { %795 = vrot.lane.b32.xlu1 %v4278_v1, %s4076_s28  ;;  %781 = vrot.lane.b32.xlu0 %v4286_v3, %s4074_s1 }
 0x102   :  { %787 = vrot.lane.b32.xlu1 %v4286_v3, %s4075_s22  ;;  %793 = vrot.lane.b32.xlu0 %v4286_v3, %s4076_s28 }
 0x106   :  { %503 = vrot.lane.b32.xlu1 %v4255_v57, %s4076_s28  ;;  %501 = vrot.lane.b32.xlu0 %v4257_v59, %s4076_s28 }
 0x15c   :  { %v4346_v29 = vpop.permute.xlu1 %491 }
 0x15d   :  { %v4348_v30 = vpop.permute.xlu0 %489 }
 0x160   :  { %v498_v31 = vpop.permute.xlu1 %497 }
 0x161   :  { %v496_v32 = vpop.permute.xlu0 %495  ;;  %v575_v40 = vcombine.low %v4255_v57, %v498_v31  ;;  %v576_v50 = vcombine.high %v4255_v57, %v498_v31 }
 0x162   :  { %v507_v52 = vcombine.low %v4257_v59, %v496_v32  ;;  %v508_v53 = vcombine.high %v4257_v59, %v496_v32 }
 0x163   :  { %v583_v51 = vrot.slane %v575_v40, %v4192_v22  ;;  %v590_v9 = vrot.slane %v576_v50, %v4192_v22 }
 0x164   :  { %v515_v10 = vrot.slane %v507_v52, %v4192_v22  ;;  %v522_v28 = vrot.slane %v508_v53, %v4192_v22 }
 0x16c   :  { %v790_v35 = vpop.permute.xlu1 %789  ;;  %v784_v36 = vpop.permute.xlu0 %783 }
 0x16d   :  { %v867_v38 = vcombine.low %v4278_v1, %v790_v35  ;;  %v868_v39 = vcombine.high %v4278_v1, %v790_v35 }
 0x16f   :  { %v875_v46 = vrot.slane %v867_v38, %v4192_v22  ;;  %v882_v47 = vrot.slane %v868_v39, %v4192_v22 }
 0x170   :  { %v796_v41 = vpop.permute.xlu1 %795  ;;  %v782_v42 = vpop.permute.xlu0 %781 }
 0x171   :  { %v883_v43 = vcombine.low %v784_v36, %v796_v41  ;;  %v884_v44 = vcombine.high %v784_v36, %v796_v41 }
 0x173   :  { %v891_v48 = vrot.slane %v883_v43, %v4192_v22  ;;  %v898_v49 = vrot.slane %v884_v44, %v4192_v22 }
 0x174   :  { %v788_v54 = vpop.permute.xlu1 %787  ;;  %v794_v55 = vpop.permute.xlu0 %793 }
 0x175   :  { %v899_v17 = vcombine.low %v875_v46, %v891_v48  ;;  %v900_v56 = vcombine.high %v875_v46, %v891_v48  ;;  %v915_v58 = vcombine.low %v882_v47, %v898_v49  ;;  %v916_v60 = vcombine.high %v882_v47, %v898_v49 }
 0x176   :  { %v799_v61 = vcombine.low %v4286_v3, %v788_v54  ;;  %v800_v62 = vcombine.high %v4286_v3, %v788_v54  ;;  %v815_v63 = vcombine.low %v782_v42, %v794_v55  ;;  %v816_v0 = vcombine.high %v782_v42, %v794_v55 }
 0x177   :  { %v4367_v57 = vrot.slane %v899_v17, %v4354_v45  ;;  %v4370_v1 = vrot.slane %v900_v56, %v4354_v45  ;;  %v4373_v59 = vrot.slane %v915_v58, %v4354_v45  ;;  %v4376_v2 = vrot.slane %v916_v60, %v4354_v45 }
 0x178   :  { %v807_v4 = vrot.slane %v799_v61, %v4192_v22  ;;  %v814_v6 = vrot.slane %v800_v62, %v4192_v22  ;;  %v823_v3 = vrot.slane %v815_v63, %v4192_v22  ;;  %v830_v7 = vrot.slane %v816_v0, %v4192_v22  ;;  %v504_v8 = vpop.permute.xlu1 %503  ;;  %v502_v34 = vpop.permute.xlu0 %501 }
 0x179   :  { %v3573_v11 = vcombine.high %v4367_v57, %v4373_v59  ;;  %v3574_v12 = vcombine.high %v4370_v1, %v4376_v2  ;;  %v591_v20 = vcombine.low %v4346_v29, %v504_v8  ;;  %v592_v21 = vcombine.high %v4346_v29, %v504_v8 }
 0x17a   :  { %v831_v13 = vcombine.low %v807_v4, %v823_v3  ;;  %v832_v14 = vcombine.high %v807_v4, %v823_v3  ;;  %v847_v15 = vcombine.low %v814_v6, %v830_v7  ;;  %v848_v16 = vcombine.high %v814_v6, %v830_v7 }
 0x17b   :  { %v4389_v18 = vrot.slane %v3573_v11, %v4192_v22  ;;  %v4392_v19 = vrot.slane %v3574_v12, %v4192_v22  ;;  %v951_v31 = vcombine.low %v4367_v57, %v4373_v59  ;;  %v599_v32 = vrot.slane %v591_v20, %v4192_v22 }
 0x17c   :  { %v839_v23 = vrot.slane %v831_v13, %v4354_v45  ;;  %v846_v24 = vrot.slane %v832_v14, %v4354_v45  ;;  %v855_v25 = vrot.slane %v847_v15, %v4354_v45  ;;  %v862_v26 = vrot.slane %v848_v16, %v4354_v45 }
 0x17d   :  { %v606_v33 = vrot.slane %v592_v21, %v4192_v22  ;;  %v959_v29 = vcombine.low %v4370_v1, %v4376_v2  ;;  %v1051_v35 = vcombine.low %v4389_v18, %v4392_v19  ;;  %v607_v38 = vcombine.low %v583_v51, %v599_v32 }
 0x17e   :  { %v3571_v36 = vcombine.high %v839_v23, %v855_v25  ;;  %v3572_v37 = vcombine.high %v846_v24, %v862_v26  ;;  %v608_v39 = vcombine.high %v583_v51, %v599_v32  ;;  %v523_v44 = vcombine.low %v4348_v30, %v502_v34 }
 0x17f   :  { %v623_v40 = vcombine.low %v590_v9, %v606_v33  ;;  %v624_v41 = vcombine.high %v590_v9, %v606_v33  ;;  %v524_v46 = vcombine.high %v4348_v30, %v502_v34  ;;  %v615_v47 = vrot.slane %v607_v38, %v4354_v45 }
 0x180   :  { %v1010_v42 = vrot.slane %v3571_v36, %v4192_v22  ;;  %v1018_v43 = vrot.slane %v3572_v37, %v4192_v22  ;;  %v622_v48 = vrot.slane %v608_v39, %v4354_v45  ;;  %v935_v52 = vcombine.low %v839_v23, %v855_v25 }
 0x181   :  { %v631_v49 = vrot.slane %v623_v40, %v4354_v45  ;;  %v638_v50 = vrot.slane %v624_v41, %v4354_v45  ;;  %v943_v51 = vcombine.low %v846_v24, %v862_v26  ;;  %v531_v53 = vrot.slane %v523_v44, %v4192_v22 }
 0x182   :  { %v538_v54 = vrot.slane %v524_v46, %v4192_v22  ;;  %v1035_v63 = vcombine.low %v1010_v42, %v1018_v43  ;;  %v1036_v0 = vcombine.high %v1010_v42, %v1018_v43  ;;  %v942_v9 = vrot.slane %v935_v52, %v4192_v22 }
 0x183   :  { %v659_v55 = vcombine.low %v615_v47, %v631_v49  ;;  %v667_v17 = vcombine.low %v622_v48, %v638_v50  ;;  %v3569_v56 = vcombine.high %v615_v47, %v631_v49  ;;  %v3570_v58 = vcombine.high %v622_v48, %v638_v50 }
 0x184   :  { %v539_v60 = vcombine.low %v515_v10, %v531_v53  ;;  %v540_v30 = vcombine.high %v515_v10, %v531_v53  ;;  %v555_v61 = vcombine.low %v522_v28, %v538_v54  ;;  %v556_v62 = vcombine.high %v522_v28, %v538_v54 }
 0x185   :  { %v734_v57 = vrot.slane %v3569_v56, %v4192_v22  ;;  %v742_v1 = vrot.slane %v3570_v58, %v4192_v22  ;;  %v4426_v3 = vrot.slane %v659_v55, %v4192_v22  ;;  %v674_v7 = vrot.slane %v667_v17, %v4192_v22 }
 0x186   :  { %v547_v59 = vrot.slane %v539_v60, %v4354_v45  ;;  %v554_v2 = vrot.slane %v540_v30, %v4354_v45  ;;  %v563_v4 = vrot.slane %v555_v61, %v4354_v45  ;;  %v570_v6 = vrot.slane %v556_v62, %v4354_v45 }
 0x187   :  { %v759_v8 = vcombine.low %v734_v57, %v742_v1  ;;  %v950_v14 = vrot.slane %v943_v51, %v4192_v22  ;;  %v958_v15 = vrot.slane %v951_v31, %v4192_v22  ;;  %v966_v16 = vrot.slane %v959_v29, %v4192_v22 }
 0x188   :  { %v643_v10 = vcombine.low %v547_v59, %v563_v4  ;;  %v651_v11 = vcombine.low %v554_v2, %v570_v6  ;;  %v3567_v12 = vcombine.high %v547_v59, %v563_v4  ;;  %v3568_v13 = vcombine.high %v554_v2, %v570_v6  ;;  %v3746_v6 = vpop.f32.mrb[4].mxu0 }
 0x189   :  { %v4434_v20 = vrot.slane %v1035_v63, %v4354_v45  ;;  %v1052_v26 = vcombine.high %v4389_v18, %v4392_v19  ;;  %v967_v28 = vcombine.low %v942_v9, %v950_v14  ;;  %v983_v32 = vcombine.low %v958_v15, %v966_v16 }
 0x18a   :  { %v650_v21 = vrot.slane %v643_v10, %v4192_v22  ;;  %v658_v23 = vrot.slane %v651_v11, %v4192_v22  ;;  %v718_v24 = vrot.slane %v3567_v12, %v4192_v22  ;;  %v726_v25 = vrot.slane %v3568_v13, %v4192_v22 }
 0x18b   :  { %v760_v31 = vcombine.high %v734_v57, %v742_v1  ;;  %v1059_v29 = vrot.slane %v1051_v35, %v4354_v45  ;;  %v975_v36 = vrot.slane %v967_v28, %v4354_v45  ;;  %v991_v37 = vrot.slane %v983_v32, %v4354_v45 }
 0x18c   :  { %v743_v33 = vcombine.low %v718_v24, %v726_v25  ;;  %v744_v34 = vcombine.high %v718_v24, %v726_v25  ;;  %v675_v38 = vcombine.low %v650_v21, %v658_v23  ;;  %v691_v39 = vcombine.low %v4426_v3, %v674_v7 }
 0x18d   :  { %v1067_v40 = vcombine.low %v4434_v20, %v1059_v29  ;;  %v767_v18 = vrot.slane %v759_v8, %v4354_v45  ;;  %v1050_v19 = vrot.slane %v1036_v0, %v4354_v45  ;;  %v968_v42 = vcombine.high %v942_v9, %v950_v14 }
 0x18e   :  { %v751_v41 = vrot.slane %v743_v33, %v4354_v45  ;;  %v999_v43 = vcombine.low %v975_v36, %v991_v37  ;;  %v683_v44 = vrot.slane %v675_v38, %v4354_v45  ;;  %v699_v35 = vrot.slane %v691_v39, %v4354_v45  ;;  %v3560_v38 = vld [vmem:[%s4897_s8 + $0x2] ss:$0 sm:$0xff] }
 0x18f   :  { %3768 = vmatpush3.xpose.msk.msra.mxu0 %vm1363_vm3, %v1067_v40  ;;  %v1066_v47 = vrot.slane %v1052_v26, %v4354_v45  ;;  %v984_v48 = vcombine.high %v958_v15, %v966_v16  ;;  %v758_v50 = vrot.slane %v744_v34, %v4354_v45  ;;  %v692_v52 = vcombine.high %v4426_v3, %v674_v7  ;;  %v478_v3 = vpop.f32.mrb[5].mxu0 }
 0x190   :  { %v775_v46 = vcombine.low %v751_v41, %v767_v18  ;;  %3748 = vmatpush3.xpose.msk.msra.mxu1 %vm1363_vm3, %v999_v43  ;;  %3777 = vmatprep.subr.mxu0 %v4077_v27  ;;  %v707_v49 = vcombine.low %v683_v44, %v699_v35  ;;  %v676_v51 = vcombine.high %v650_v21, %v658_v23 }
 0x191   :  { %3752 = vmatprep.subr.mxu1 %v4077_v27  ;;  %v1069_v53 = vcombine.low %v1050_v19, %v1066_v47  ;;  %v774_v54 = vrot.slane %v760_v31, %v4354_v45  ;;  %v1000_v55 = vcombine.high %v975_v36, %v991_v37  ;;  %v982_v17 = vrot.slane %v968_v42, %v4354_v45 }
 0x192   :  { %3770 = vmatmul.mubr.msk.f32.vlgmr.msra.gmra.mrb[6].mxu0 %vm1363_vm3, %v775_v46  ;;  %v998_v56 = vrot.slane %v984_v48, %v4354_v45  ;;  %v708_v60 = vcombine.high %v683_v44, %v699_v35  ;;  %v690_v30 = vrot.slane %v676_v51, %v4354_v45  ;;  %v706_v61 = vrot.slane %v692_v52, %v4354_v45 }
 0x193   :  { %3750 = vmatmul.mubr.msk.f32.vlgmr.msra.gmra.mrb[0].mxu1 %vm1363_vm3, %v707_v49  ;;  %3778 = vmatpush3.xpose.msk.msra.mxu0 %vm1363_vm3, %v1069_v53  ;;  %v777_v58 = vcombine.low %v758_v50, %v774_v54  ;;  %v1068_v1 = vcombine.high %v4434_v20, %v1059_v29  ;;  %v776_v59 = vcombine.high %v751_v41, %v767_v18 }
 0x194   :  { %3753 = vmatpush3.xpose.msk.msra.mxu1 %vm1363_vm3, %v1000_v55  ;;  %3754 = vmatprep.mubr.msk.f32.mxu1 %vm4078_vm2, %v4077_v27  ;;  %v1001_v62 = vcombine.low %v982_v17, %v998_v56  ;;  %v709_v63 = vcombine.low %v690_v30, %v706_v61  ;;  %v1002_v0 = vcombine.high %v982_v17, %v998_v56 }
 0x195   :  { %3757 = vmatprep.subr.mxu1 %v4077_v27  ;;  %3779 = vmatprep.mubr.msk.f32.mxu0 %vm4078_vm2, %v4077_v27  ;;  %v710_v57 = vcombine.high %v690_v30, %v706_v61  ;;  %v1070_v2 = vcombine.high %v1050_v19, %v1066_v47  ;;  %v778_v4 = vcombine.high %v758_v50, %v774_v54 }
 0x196   :  { %3780 = vmatmul.mubr.msk.f32.vlgmr.msra.gmra.mrb[8].mxu0 %vm1363_vm3, %v777_v58  ;;  %3787 = vmatprep.subr.mxu0 %v4077_v27  ;;  %v4512_v39 = vadd.f32 %v3560_v38, %v478_v3  ;;  %v4518_v40 = vadd.f32 %v3746_v6, %v3560_v38 }
 0x197   :  { %3755 = vmatmul.mubr.msk.f32.vlgmr.msra.gmra.mrb[2].mxu1 %vm1363_vm3, %v708_v60  ;;  %3789 = vmatprep.mubr.msk.f32.mxu0 %vm4078_vm2, %v4077_v27 }
 0x198   :  { %3758 = vmatpush3.xpose.msk.msra.mxu1 %vm1363_vm3, %v1001_v62  ;;  %3759 = vmatprep.mubr.msk.f32.mxu1 %vm4078_vm2, %v4077_v27 }
 0x199   :  { %3762 = vmatprep.subr.mxu1 %v4077_v27 }
 0x19b   :  { %3760 = vmatmul.mubr.msk.f32.vlgmr.msra.gmra.mrb[4].mxu1 %vm1363_vm3, %v709_v63 }
 0x19c   :  { %3763 = vmatpush3.xpose.msk.msra.mxu1 %vm1363_vm3, %v1002_v0  ;;  %3764 = vmatprep.mubr.msk.f32.mxu1 %vm4078_vm2, %v4077_v27 }
 0x19d   :  { %3772 = vmatprep.subr.mxu1 %v4077_v27 }
 0x19f   :  { %3765 = vmatmul.mubr.msk.f32.vlgmr.msra.gmra.mrb[6].mxu1 %vm1363_vm3, %v710_v57 }
 0x1a0   :  { %3773 = vmatpush3.xpose.msk.msra.mxu1 %vm1363_vm3, %v1068_v1  ;;  %3774 = vmatprep.mubr.msk.f32.mxu1 %vm4078_vm2, %v4077_v27 }
 0x1a1   :  { %3782 = vmatprep.subr.mxu1 %v4077_v27 }
 0x1a3   :  { %3775 = vmatmul.mubr.msk.f32.vlgmr.msra.gmra.mrb[8].mxu1 %vm1363_vm3, %v776_v59 }
 0x1a4   :  { %3783 = vmatpush3.xpose.msk.msra.mxu1 %vm1363_vm3, %v1070_v2  ;;  %3784 = vmatprep.mubr.msk.f32.mxu1 %vm4078_vm2, %v4077_v27 }
 0x1a5   :  { %3792 = vmatprep.subr.mxu1 %v4077_v27 }
 0x1a7   :  { %3785 = vmatmul.mubr.msk.f32.vlgmr.msra.gmra.mrb[10].mxu1 %vm1363_vm3, %v778_v4 }
 0x1a8   :  { %3794 = vmatprep.mubr.msk.f32.mxu1 %vm4078_vm2, %v4077_v27 }
 0x265   :  { %v1740_v7 = vpop.f32.mrb[6].mxu0 }
 0x266   :  { %v1436_v8 = vpop.f32.mrb[0].mxu1  ;;  %v3771_v9 = vpop.f32.mrb[7].mxu0  ;;  %v1984_v23 = vsel %vm1363_vm3, %v1740_v7, -inf }
 0x267   :  { %v3751_v10 = vpop.f32.mrb[1].mxu1  ;;  %v1972_v11 = vsel %vm1363_vm3, %v1436_v8, -inf }
 0x268   :  { %1973 = vmax.xlane.f32.xlu0 %v1972_v11 }
 0x269   :  { %v1892_v12 = vpop.f32.mrb[8].mxu0 }
 0x26a   :  { %v1512_v13 = vpop.f32.mrb[2].mxu1  ;;  %v3781_v14 = vpop.f32.mrb[9].mxu0  ;;  %v1990_v28 = vsel %vm1363_vm3, %v1892_v12, -inf }
 0x26b   :  { %v3756_v15 = vpop.f32.mrb[3].mxu1  ;;  %v1975_v16 = vsel %vm1363_vm3, %v1512_v13, -inf }
 0x26c   :  { %1976 = vmax.xlane.f32.xlu1 %v1975_v16 }
 0x26e   :  { %v1588_v20 = vpop.f32.mrb[4].mxu1 }
 0x26f   :  { %v3761_v21 = vpop.f32.mrb[5].mxu1  ;;  %v1978_v24 = vsel %vm1363_vm3, %v1588_v20, -inf }
 0x270   :  { %1985 = vmax.xlane.f32.xlu1 %v1984_v23  ;;  %1979 = vmax.xlane.f32.xlu0 %v1978_v24 }
 0x272   :  { %v1664_v25 = vpop.f32.mrb[6].mxu1 }
 0x273   :  { %v3766_v26 = vpop.f32.mrb[7].mxu1  ;;  %v1981_v32 = vsel %vm1363_vm3, %v1664_v25, -inf }
 0x274   :  { %1991 = vmax.xlane.f32.xlu1 %v1990_v28  ;;  %1982 = vmax.xlane.f32.xlu0 %v1981_v32 }
 0x276   :  { %v1816_v31 = vpop.f32.mrb[8].mxu1 }
 0x277   :  { %v3776_v33 = vpop.f32.mrb[9].mxu1  ;;  %v1987_v34 = vsel %vm1363_vm3, %v1816_v31, -inf }
 0x278   :  { %1988 = vmax.xlane.f32.xlu0 %v1987_v34 }
 0x27a   :  { %v1968_v29 = vpop.f32.mrb[10].mxu1 }
 0x27b   :  { %v3786_v36 = vpop.f32.mrb[11].mxu1  ;;  %v1993_v37 = vsel %vm1363_vm3, %v1968_v29, -inf }
 0x27c   :  { %1994 = vmax.xlane.f32.xlu0 %v1993_v37 }
 0x285   :  { %1073 = vrot.lane.b32.xlu1 %v4512_v39, %s4074_s1 }
 0x289   :  { %1079 = vrot.lane.b32.xlu1 %v4512_v39, %s4075_s22 }
 0x28d   :  { %1081 = vrot.lane.b32.xlu1 %v4518_v40, %s4075_s22  ;;  %s4083_s22 = smov [#allocation2]  }
 0x291   :  { %1087 = vrot.lane.b32.xlu1 %v4518_v40, %s4076_s28 }
 0x292   :  { %1075 = vrot.lane.b32.xlu0 %v4518_v40, %s4074_s1 }
 0x296   :  { %1085 = vrot.lane.b32.xlu0 %v4512_v39, %s4076_s28  ;;  %s3535_s28 = sshll.u32 %s4083_s22, 4  ;;  %s3536_s28 = int_to_ptr.vmem [resolvable:$true] %s3535_s28 }
 0x297   :  { %p4054_p1 = scmp.lt.s32.totalorder %s3536_s28, %s3536_s28 }
 0x2f5   :  { %v1974_v41 = vpop.xlane.xlu0 %1973 }
 0x2f6   :  { %v1996_v18 = vsub.f32 %v1436_v8, %v1974_v41 }
 0x2f8   :  { %v2004_v19 = vmul.f32 1.442695, %v1996_v18 }
 0x2f9   :  { %v1977_v42 = vpop.xlane.xlu1 %1976 }
 0x2fa   :  { %4001 = vpow2.f32 %v2004_v19  ;;  %v1997_v43 = vsub.f32 %v1512_v13, %v1977_v42 }
 0x2fc   :  { %v2006_v48 = vmul.f32 1.442695, %v1997_v43 }
 0x2fd   :  { %v1986_v44 = vpop.xlane.xlu1 %1985  ;;  %v1980_v35 = vpop.xlane.xlu0 %1979 }
 0x2fe   :  { %v2000_v46 = vsub.f32 %v1740_v7, %v1986_v44  ;;  %v1998_v47 = vsub.f32 %v1588_v20, %v1980_v35 }
 0x300   :  { %v2012_v49 = vmul.f32 1.442695, %v2000_v46  ;;  %v2008_v50 = vmul.f32 1.442695, %v1998_v47 }
 0x301   :  { %v1992_v52 = vpop.xlane.xlu1 %1991  ;;  %v1983_v51 = vpop.xlane.xlu0 %1982 }
 0x302   :  { %4003 = vpow2.f32 %v2012_v49  ;;  %v2002_v53 = vsub.f32 %v1892_v12, %v1992_v52  ;;  %v1999_v54 = vsub.f32 %v1664_v25, %v1983_v51 }
 0x303   :  { %4005 = vpow2.f32 %v2008_v50 }
 0x304   :  { %v4528_v55 = vpop.eup %4001  ;;  %4007 = vpow2.f32 %v2006_v48  ;;  %v2016_v17 = vmul.f32 1.442695, %v2002_v53  ;;  %v2010_v56 = vmul.f32 1.442695, %v1999_v54 }
 0x305   :  { %v1074_v58 = vpop.permute.xlu1 %1073  ;;  %v1989_v60 = vpop.xlane.xlu0 %1988  ;;  %v2020_v30 = vsel %vm1363_vm3, %v4528_v55, 0.0 }
 0x306   :  { %v2001_v61 = vsub.f32 %v1816_v31, %v1989_v60  ;;  %2021 = vadd.xlane.f32.xlu1 %v2020_v30  ;;  %4009 = vpow2.f32 %v2016_v17 }
 0x307   :  { %4011 = vpow2.f32 %v2010_v56 }
 0x308   :  { %v2014_v62 = vmul.f32 1.442695, %v2001_v61 }
 0x309   :  { %v1080_v63 = vpop.permute.xlu1 %1079  ;;  %v1995_v0 = vpop.xlane.xlu0 %1994 }
 0x30a   :  { %4013 = vpow2.f32 %v2014_v62  ;;  %v2003_v57 = vsub.f32 %v1968_v29, %v1995_v0  ;;  %v1091_v9 = vcombine.low %v4512_v39, %v1080_v63  ;;  %v1092_v13 = vcombine.high %v4512_v39, %v1080_v63 }
 0x30c   :  { %v4532_v1 = vpop.eup %4003  ;;  %v2018_v2 = vmul.f32 1.442695, %v2003_v57  ;;  %v1099_v26 = vrot.slane %v1091_v9, %v4192_v22  ;;  %v1106_v37 = vrot.slane %v1092_v13, %v4192_v22 }
 0x30d   :  { %v4534_v59 = vpop.eup %4005  ;;  %v1082_v4 = vpop.permute.xlu1 %1081  ;;  %v2032_v3 = vsel %vm1363_vm3, %v4532_v1, 0.0 }
 0x30e   :  { %v1076_v6 = vpop.permute.xlu0 %1075  ;;  %v4538_v7 = vpop.eup %4007  ;;  %v2026_v8 = vsel %vm1363_vm3, %v4534_v59, 0.0  ;;  %2033 = vadd.xlane.f32.xlu0 %v2032_v3  ;;  %v1159_v10 = vcombine.low %v4518_v40, %v1082_v4  ;;  %v1160_v11 = vcombine.high %v4518_v40, %v1082_v4  ;;  %4015 = vpow2.f32 %v2018_v2 }
 0x30f   :  { %2027 = vadd.xlane.f32.xlu1 %v2026_v8  ;;  %v2023_v16 = vsel %vm1363_vm3, %v4538_v7, 0.0 }
 0x310   :  { %v4545_v12 = vpop.eup %4009  ;;  %v1167_v28 = vrot.slane %v1159_v10, %v4192_v22  ;;  %v1174_v32 = vrot.slane %v1160_v11, %v4192_v22 }
 0x311   :  { %v1088_v14 = vpop.permute.xlu1 %1087  ;;  %v4550_v20 = vpop.eup %4011  ;;  %v2038_v40 = vsel %vm1363_vm3, %v4545_v12, 0.0 }
 0x312   :  { %v1086_v15 = vpop.permute.xlu0 %1085  ;;  %v1175_v21 = vcombine.low %v1076_v6, %v1088_v14  ;;  %v1176_v23 = vcombine.high %v1076_v6, %v1088_v14  ;;  %2024 = vadd.xlane.f32.xlu0 %v2023_v16  ;;  %v2029_v39 = vsel %vm1363_vm3, %v4550_v20, 0.0 }
 0x313   :  { %v1107_v24 = vcombine.low %v1074_v58, %v1086_v15  ;;  %v1108_v25 = vcombine.high %v1074_v58, %v1086_v15 }
 0x314   :  { %v4555_v31 = vpop.eup %4013  ;;  %v1183_v33 = vrot.slane %v1175_v21, %v4192_v22  ;;  %v1190_v34 = vrot.slane %v1176_v23, %v4192_v22 }
 0x315   :  { %v1115_v29 = vrot.slane %v1107_v24, %v4192_v22  ;;  %v1122_v36 = vrot.slane %v1108_v25, %v4192_v22  ;;  %v2035_v38 = vsel %vm1363_vm3, %v4555_v31, 0.0 }
 0x316   :  { %v1191_v41 = vcombine.low %v1167_v28, %v1183_v33  ;;  %v1192_v18 = vcombine.high %v1167_v28, %v1183_v33  ;;  %v1207_v19 = vcombine.low %v1174_v32, %v1190_v34  ;;  %v1208_v42 = vcombine.high %v1174_v32, %v1190_v34  ;;  %2036 = vadd.xlane.f32.xlu1 %v2035_v38 }
 0x317   :  { %v1123_v43 = vcombine.low %v1099_v26, %v1115_v29  ;;  %v1124_v44 = vcombine.high %v1099_v26, %v1115_v29  ;;  %v1139_v35 = vcombine.low %v1106_v37, %v1122_v36  ;;  %v1140_v46 = vcombine.high %v1106_v37, %v1122_v36  ;;  %2030 = vadd.xlane.f32.xlu0 %v2029_v39 }
 0x318   :  { %v1199_v47 = vrot.slane %v1191_v41, %v4354_v45  ;;  %v1206_v48 = vrot.slane %v1192_v18, %v4354_v45  ;;  %v1215_v49 = vrot.slane %v1207_v19, %v4354_v45  ;;  %v1222_v50 = vrot.slane %v1208_v42, %v4354_v45  ;;  %v4576_v30 = vpop.eup %4015 }
 0x319   :  { %v1131_v52 = vrot.slane %v1123_v43, %v4354_v45  ;;  %v1138_v51 = vrot.slane %v1124_v44, %v4354_v45  ;;  %v1147_v53 = vrot.slane %v1139_v35, %v4354_v45  ;;  %v1154_v54 = vrot.slane %v1140_v46, %v4354_v45 }
 0x31a   :  { %v1243_v17 = vcombine.low %v1199_v47, %v1215_v49  ;;  %v1251_v56 = vcombine.low %v1206_v48, %v1222_v50  ;;  %v3577_v58 = vcombine.high %v1199_v47, %v1215_v49  ;;  %v3578_v60 = vcombine.high %v1206_v48, %v1222_v50 }
 0x31b   :  { %v1227_v61 = vcombine.low %v1131_v52, %v1147_v53  ;;  %v1235_v62 = vcombine.low %v1138_v51, %v1154_v54  ;;  %v3575_v63 = vcombine.high %v1131_v52, %v1147_v53  ;;  %v3576_v0 = vcombine.high %v1138_v51, %v1154_v54  ;;  %2039 = vadd.xlane.f32.xlu0 %v2038_v40 }
 0x31c   :  { %v1250_v57 = vrot.slane %v1243_v17, %v4192_v22  ;;  %v1258_v2 = vrot.slane %v1251_v56, %v4192_v22  ;;  %v1318_v4 = vrot.slane %v3577_v58, %v4192_v22  ;;  %v1326_v6 = vrot.slane %v3578_v60, %v4192_v22 }
 0x31d   :  { %v1234_v3 = vrot.slane %v1227_v61, %v4192_v22  ;;  %v1242_v8 = vrot.slane %v1235_v62, %v4192_v22  ;;  %v1302_v9 = vrot.slane %v3575_v63, %v4192_v22  ;;  %v1310_v10 = vrot.slane %v3576_v0, %v4192_v22 }
 0x31e   :  { %v2041_v11 = vsel %vm1363_vm3, %v4576_v30, 0.0  ;;  %v1275_v13 = vcombine.low %v1250_v57, %v1258_v2  ;;  %v1276_v14 = vcombine.high %v1250_v57, %v1258_v2  ;;  %v1343_v15 = vcombine.low %v1318_v4, %v1326_v6 }
 0x31f   :  { %2042 = vadd.xlane.f32.xlu0 %v2041_v11  ;;  %v1259_v16 = vcombine.low %v1234_v3, %v1242_v8  ;;  %v1260_v21 = vcombine.high %v1234_v3, %v1242_v8  ;;  %v1327_v23 = vcombine.low %v1302_v9, %v1310_v10  ;;  %v1328_v24 = vcombine.high %v1302_v9, %v1310_v10 }
 0x320   :  { %v1283_v25 = vrot.slane %v1275_v13, %v4354_v45  ;;  %v1290_v26 = vrot.slane %v1276_v14, %v4354_v45  ;;  %v4591_v28 = vrot.slane %v1343_v15, %v4354_v45  ;;  %v1344_v32 = vcombine.high %v1318_v4, %v1326_v6 }
 0x321   :  { %v1267_v33 = vrot.slane %v1259_v16, %v4354_v45  ;;  %v1274_v34 = vrot.slane %v1260_v21, %v4354_v45  ;;  %v1335_v29 = vrot.slane %v1327_v23, %v4354_v45  ;;  %v4597_v36 = vrot.slane %v1328_v24, %v4354_v45 }
 0x322   :  { %v4600_v37 = vrot.slane %v1344_v32, %v4354_v45 }
 0x323   :  { %v1291_v38 = vcombine.low %v1267_v33, %v1283_v25  ;;  %v1292_v39 = vcombine.high %v1267_v33, %v1283_v25  ;;  %v1293_v40 = vcombine.low %v1274_v34, %v1290_v26  ;;  %v1359_v41 = vcombine.low %v1335_v29, %v4591_v28 }
 0x324   :  { %v1294_v18 = vcombine.high %v1274_v34, %v1290_v26  ;;  %v1361_v19 = vcombine.low %v4597_v36, %v4600_v37  ;;  %v1360_v42 = vcombine.high %v1335_v29, %v4591_v28  ;;  %v1362_v43 = vcombine.high %v4597_v36, %v4600_v37 }
 0x325   :  { %3788 = vmatpush3.msra.mxu0 %v1291_v38  ;;  %3793 = vmatpush3.msra.mxu1 %v1292_v39 }
 0x326   :  { %3797 = vmatprep.subr.mxu0 %v4077_v27  ;;  %3802 = vmatprep.subr.mxu1 %v4077_v27 }
 0x393   :  { %v2022_v44 = vpop.xlane.xlu1 %2021 }
 0x394   :  { %4017 = vrcp.f32 %v2022_v44 }
 0x39b   :  { %v2034_v35 = vpop.xlane.xlu0 %2033 }
 0x39c   :  { %v2028_v46 = vpop.xlane.xlu1 %2027 }
 0x39d   :  { %4019 = vrcp.f32 %v2028_v46 }
 0x39e   :  { %v4018_v47 = vpop.eup %4017  ;;  %4021 = vrcp.f32 %v2034_v35 }
 0x39f   :  { %v2052_v48 = vmul.f32 %v4018_v47, %v4528_v55  ;;  %v2025_v49 = vpop.xlane.xlu0 %2024 }
 0x3a0   :  { %4023 = vrcp.f32 %v2025_v49 }
 0x3a1   :  { %3790 = vmatmul.mubr.msk.f32.vlgmr.msra.gmra.mrb[10].mxu0 %vm1363_vm3, %v2052_v48 }
 0x3a2   :  { %3798 = vmatpush3.msra.mxu0 %v1293_v40  ;;  %3799 = vmatprep.mubr.msk.f32.mxu0 %vm4078_vm2, %v4077_v27 }
 0x3a3   :  { %3807 = vmatprep.subr.mxu0 %v4077_v27  ;;  %v2037_v50 = vpop.xlane.xlu1 %2036 }
 0x3a4   :  { %v2031_v52 = vpop.xlane.xlu0 %2030 }
 0x3a5   :  { %4025 = vrcp.f32 %v2031_v52 }
 0x3a6   :  { %4027 = vrcp.f32 %v2037_v50 }
 0x3a7   :  { %v4020_v51 = vpop.eup %4019 }
 0x3a8   :  { %v2054_v53 = vmul.f32 %v4020_v51, %v4534_v59  ;;  %v2040_v54 = vpop.xlane.xlu0 %2039  ;;  %v4022_v55 = vpop.eup %4021 }
 0x3a9   :  { %4029 = vrcp.f32 %v2040_v54  ;;  %v2056_v58 = vmul.f32 %v4022_v55, %v4532_v1 }
 0x3aa   :  { %v4024_v17 = vpop.eup %4023  ;;  %3800 = vmatmul.mubr.msk.f32.vlgmr.msra.gmra.mrb[12].mxu0 %vm1363_vm3, %v2054_v53 }
 0x3ab   :  { %v2053_v56 = vmul.f32 %v4024_v17, %v4538_v7  ;;  %3808 = vmatpush3.msra.mxu0 %v1359_v41  ;;  %3809 = vmatprep.mubr.msk.f32.mxu0 %vm4078_vm2, %v4077_v27 }
 0x3ac   :  { %v2043_v60 = vpop.xlane.xlu0 %2042  ;;  %3817 = vmatprep.subr.mxu0 %v4077_v27 }
 0x3ad   :  { %4031 = vrcp.f32 %v2043_v60  ;;  %3795 = vmatmul.mubr.msk.f32.vlgmr.msra.gmra.mrb[12].mxu1 %vm1363_vm3, %v2053_v56 }
 0x3ae   :  { %3803 = vmatpush3.msra.mxu1 %v1294_v18  ;;  %3810 = vmatmul.mubr.msk.f32.vlgmr.msra.gmra.mrb[14].mxu0 %vm1363_vm3, %v2056_v58 }
 0x3af   :  { %v4026_v59 = vpop.eup %4025  ;;  %3818 = vmatpush3.msra.mxu0 %v1361_v19  ;;  %3804 = vmatprep.mubr.msk.f32.mxu1 %vm4078_vm2, %v4077_v27 }
 0x3b0   :  { %v2055_v7 = vmul.f32 %v4026_v59, %v4550_v20  ;;  %3812 = vmatprep.subr.mxu1 %v4077_v27  ;;  %3819 = vmatprep.mubr.msk.f32.mxu0 %vm4078_vm2, %v4077_v27  ;;  %v4028_v1 = vpop.eup %4027 }
 0x3b1   :  { %v2057_v62 = vmul.f32 %v4028_v1, %v4555_v31  ;;  %v2948_v31 = vld [vmem:[%s4894_s5] sm:$0xff] }
 0x3b2   :  { %3805 = vmatmul.mubr.msk.f32.vlgmr.msra.gmra.mrb[14].mxu1 %vm1363_vm3, %v2055_v7 }
 0x3b3   :  { %v4030_v61 = vpop.eup %4029  ;;  %3813 = vmatpush3.msra.mxu1 %v1360_v42  ;;  %3814 = vmatprep.mubr.msk.f32.mxu1 %vm4078_vm2, %v4077_v27 }
 0x3b4   :  { %v2058_v63 = vmul.f32 %v4030_v61, %v4545_v12  ;;  %3822 = vmatprep.subr.mxu1 %v4077_v27  ;;  %v2949_v12 = vld [vmem:[%s4894_s5 + $0x8] sm:$0xff] }
 0x3b5   :  { %v3920_v57 = vpack.c.bf16 %v2949_v12, %v2948_v31 }
 0x3b6   :  { %3815 = vmatmul.mubr.msk.f32.vlgmr.msra.gmra.mrb[16].mxu1 %vm1363_vm3, %v2057_v62  ;;  %3820 = vmatmul.mubr.msk.f32.vlgmr.msra.gmra.mrb[16].mxu0 %vm1363_vm3, %v2058_v63 }
 0x3b7   :  { %v4032_v20 = vpop.eup %4031  ;;  %3823 = vmatpush3.msra.mxu1 %v1362_v43  ;;  %3824 = vmatprep.mubr.msk.f32.mxu1 %vm4078_vm2, %v4077_v27 }
 0x3b8   :  { %v2059_v0 = vmul.f32 %v4032_v20, %v4576_v30  ;;  %3922 = vmatprep.subr.msk.bf16.mxu0 %vm4152_vm1, %v3920_v57 }
 0x3b9   :  { %3925 = vmatpush3.bf16.xpose.msk.msra.mxu0 %vm4152_vm1, %v3920_v57 }
 0x3ba   :  { %3825 = vmatmul.mubr.msk.f32.vlgmr.msra.gmra.mrb[18].mxu1 %vm1363_vm3, %v2059_v0 }
 0x474   :  { %v2129_v2 = vpop.f32.mrb[10].mxu0 }
 0x475   :  { %v3791_v4 = vpop.f32.mrb[11].mxu0 }
 0x47d   :  { %v2275_v30 = vpop.f32.mrb[12].mxu0 }
 0x47e   :  { %v2644_v6 = vcombine.low %v2129_v2, %v2275_v30  ;;  %v2645_v3 = vcombine.high %v2129_v2, %v2275_v30  ;;  %v3801_v8 = vpop.f32.mrb[13].mxu0 }
 0x480   :  { %v2202_v9 = vpop.f32.mrb[12].mxu1  ;;  %v2652_v23 = vrot.slane %v2644_v6, %v4192_v22  ;;  %v2659_v24 = vrot.slane %v2645_v3, %v4192_v22 }
 0x481   :  { %v2421_v10 = vpop.f32.mrb[14].mxu0  ;;  %v3796_v11 = vpop.f32.mrb[13].mxu1 }
 0x482   :  { %v3811_v13 = vpop.f32.mrb[15].mxu0  ;;  %v2950_v11 = vld [vmem:[%s4894_s5 + $0x10] sm:$0xff] }
 0x485   :  { %v2348_v14 = vpop.f32.mrb[14].mxu1 }
 0x486   :  { %v2660_v15 = vcombine.low %v2202_v9, %v2348_v14  ;;  %v2661_v16 = vcombine.high %v2202_v9, %v2348_v14  ;;  %v3806_v21 = vpop.f32.mrb[15].mxu1 }
 0x488   :  { %v2668_v25 = vrot.slane %v2660_v15, %v4192_v22  ;;  %v2675_v26 = vrot.slane %v2661_v16, %v4192_v22 }
 0x489   :  { %v2494_v28 = vpop.f32.mrb[16].mxu1  ;;  %v2567_v32 = vpop.f32.mrb[16].mxu0 }
 0x48a   :  { %v2676_v33 = vcombine.low %v2652_v23, %v2668_v25  ;;  %v2677_v34 = vcombine.high %v2652_v23, %v2668_v25  ;;  %v2692_v29 = vcombine.low %v2659_v24, %v2675_v26  ;;  %v2693_v36 = vcombine.high %v2659_v24, %v2675_v26  ;;  %v3816_v37 = vpop.f32.mrb[17].mxu1  ;;  %v3821_v38 = vpop.f32.mrb[17].mxu0 }
 0x48b   :  { %v2712_v39 = vcombine.low %v2421_v10, %v2567_v32  ;;  %v2713_v40 = vcombine.high %v2421_v10, %v2567_v32 }
 0x48c   :  { %v2684_v18 = vrot.slane %v2676_v33, %v4354_v45  ;;  %v2691_v19 = vrot.slane %v2677_v34, %v4354_v45  ;;  %v2700_v42 = vrot.slane %v2692_v29, %v4354_v45  ;;  %v2707_v43 = vrot.slane %v2693_v36, %v4354_v45 }
 0x48d   :  { %v2640_v41 = vpop.f32.mrb[18].mxu1  ;;  %v2720_v47 = vrot.slane %v2712_v39, %v4192_v22  ;;  %v2727_v48 = vrot.slane %v2713_v40, %v4192_v22 }
 0x48e   :  { %v3826_v44 = vpop.f32.mrb[19].mxu1  ;;  %v2728_v35 = vcombine.low %v2494_v28, %v2640_v41  ;;  %v2729_v46 = vcombine.high %v2494_v28, %v2640_v41  ;;  %v2708_v52 = vcombine.high %v2684_v18, %v4077_v27  ;;  %v2709_v51 = vcombine.high %v2691_v19, %v4077_v27 }
 0x48f   :  { %v2710_v53 = vcombine.high %v2700_v42, %v4077_v27  ;;  %v2711_v54 = vcombine.high %v2707_v43, %v4077_v27 }
 0x490   :  { %v2736_v49 = vrot.slane %v2728_v35, %v4192_v22  ;;  %v2743_v50 = vrot.slane %v2729_v46, %v4192_v22  ;;  %v2780_v61 = vcombine.low %v2684_v18, %v2708_v52  ;;  %v2796_v62 = vcombine.low %v2691_v19, %v2709_v51 }
 0x491   :  { %v2848_v63 = vcombine.low %v2700_v42, %v2710_v53  ;;  %v2864_v20 = vcombine.low %v2707_v43, %v2711_v54 }
 0x492   :  { %v2744_v55 = vcombine.low %v2720_v47, %v2736_v49  ;;  %v2745_v17 = vcombine.high %v2720_v47, %v2736_v49  ;;  %v2760_v56 = vcombine.low %v2727_v48, %v2743_v50  ;;  %v2761_v58 = vcombine.high %v2727_v48, %v2743_v50 }
 0x493   :  { %v2855_v3 = vrot.slane %v2848_v63, %v4192_v22  ;;  %v2871_v8 = vrot.slane %v2864_v20, %v4192_v22  ;;  %v2787_v9 = vrot.slane %v2780_v61, %v4192_v22  ;;  %v2803_v10 = vrot.slane %v2796_v62, %v4192_v22  ;;  %v3057_v61 = vld [vmem:[%s4892_s3 + $0xe] sm:$0x3]  ;;  %v3050_v62 = vld [vmem:[%s4892_s3] sm:$0x3]  ;;  %v3051_v63 = vld [vmem:[%s4892_s3 + $0x2] sm:$0x3] }
 0x494   :  { %v2752_v60 = vrot.slane %v2744_v55, %v4354_v45  ;;  %v2759_v59 = vrot.slane %v2745_v17, %v4354_v45  ;;  %v2768_v7 = vrot.slane %v2760_v56, %v4354_v45  ;;  %v2775_v1 = vrot.slane %v2761_v58, %v4354_v45  ;;  %v3052_v20 = vld [vmem:[%s4892_s3 + $0x4] sm:$0x3] }
 0x496   :  { %v2776_v0 = vcombine.high %v2752_v60, %v4077_v27  ;;  %v2777_v31 = vcombine.high %v2759_v59, %v4077_v27  ;;  %v2778_v12 = vcombine.high %v2768_v7, %v4077_v27  ;;  %v2779_v57 = vcombine.high %v2775_v1, %v4077_v27  ;;  %v2951_v27 = vld [vmem:[%s4894_s5 + $0x18] sm:$0xff]  ;;  %s4080_s5 = smov 8  }
 0x497   :  { %v3926_v21 = vpack.c.bf16 %v2951_v27, %v2950_v11 }
 0x498   :  { %v2788_v2 = vcombine.low %v2752_v60, %v2776_v0  ;;  %v2804_v4 = vcombine.low %v2759_v59, %v2777_v31  ;;  %v2856_v30 = vcombine.low %v2768_v7, %v2778_v12  ;;  %v2872_v6 = vcombine.low %v2775_v1, %v2779_v57  ;;  %v3054_v59 = vld [vmem:[%s4892_s3 + $0x8] sm:$0x3]  ;;  %v3055_v7 = vld [vmem:[%s4892_s3 + $0xa] sm:$0x3]  ;;  %v3056_v1 = vld [vmem:[%s4892_s3 + $0xc] sm:$0x3] }
 0x499   :  { %3928 = vmatprep.subr.msk.bf16.mxu0 %vm4152_vm1, %v3926_v21  ;;  %v3053_v0 = vld [vmem:[%s4892_s3 + $0x6] sm:$0x3]  ;;  %v3083_v31 = vcombine.low %v3054_v59, %v3055_v7  ;;  %v3084_v12 = vcombine.low %v3056_v1, %v3057_v61  ;;  %v3066_v57 = vcombine.low %v3050_v62, %v3051_v63 }
 0x49a   :  { %v2863_v13 = vrot.slane %v2856_v30, %v4192_v22  ;;  %v2879_v14 = vrot.slane %v2872_v6, %v4192_v22  ;;  %v2795_v15 = vrot.slane %v2788_v2, %v4192_v22  ;;  %v2811_v16 = vrot.slane %v2804_v4, %v4192_v22  ;;  %3931 = vmatpush3.bf16.xpose.msk.msra.mxu0 %vm4152_vm1, %v3926_v21 }
 0x49b   :  { %v3067_v2 = vcombine.low %v3052_v20, %v3053_v0  ;;  %v3091_v4 = vrot.slane %v3083_v31, %v4192_v22  ;;  %v3098_v30 = vrot.slane %v3084_v12, %v4192_v22  ;;  %v3074_v6 = vrot.slane %v3066_v57, %v4192_v22  ;;  %v3610_v20 = vld [vmem:[%s4897_s8 + $0x4] ss:$0 sm:$0xff]  ;;  %v3611_v31 = vld [vmem:[%s4897_s8 + $0x5] ss:$0 sm:$0xff] }
 0x49c   :  { %v2880_v23 = vcombine.low %v2855_v3, %v2863_v13  ;;  %v2896_v24 = vcombine.low %v2871_v8, %v2879_v14  ;;  %v2812_v25 = vcombine.low %v2787_v9, %v2795_v15  ;;  %v2828_v26 = vcombine.low %v2803_v10, %v2811_v16 }
 0x49d   :  { %v2813_v28 = vcombine.high %v2787_v9, %v2795_v15  ;;  %v2829_v32 = vcombine.high %v2803_v10, %v2811_v16  ;;  %v2881_v33 = vcombine.high %v2855_v3, %v2863_v13  ;;  %v2897_v34 = vcombine.high %v2871_v8, %v2879_v14  ;;  %v3603_v8 = vld [vmem:[%s4897_s8 + $0x3] ss:$0 sm:$0xff] }
 0x49e   :  { %v2888_v29 = vrot.slane %v2880_v23, %v4354_v45  ;;  %v2904_v36 = vrot.slane %v2896_v24, %v4354_v45  ;;  %v2820_v37 = vrot.slane %v2812_v25, %v4354_v45  ;;  %v2836_v38 = vrot.slane %v2828_v26, %v4354_v45  ;;  %v3145_v24 = vld [vmem:[%s4895_s6] sm:$0xff]  ;;  %v3146_v25 = vld [vmem:[%s4895_s6 + $0x8] sm:$0xff]  ;;  %v3147_v26 = vld [vmem:[%s4895_s6 + $0x10] sm:$0xff] }
 0x49f   :  { %v2827_v39 = vrot.slane %v2813_v28, %v4354_v45  ;;  %v2843_v40 = vrot.slane %v2829_v32, %v4354_v45  ;;  %v2895_v41 = vrot.slane %v2881_v33, %v4354_v45  ;;  %v2911_v18 = vrot.slane %v2897_v34, %v4354_v45  ;;  %v3148_v32 = vld [vmem:[%s4895_s6 + $0x18] sm:$0xff]  ;;  %v3149_v34 = vld [vmem:[%s4895_s6 + $0x20] sm:$0xff] }
 0x4a0   :  { %v2913_v19 = vcombine.high %v2888_v29, %v2904_v36  ;;  %v2845_v42 = vcombine.high %v2820_v37, %v2836_v38  ;;  %v2912_v43 = vcombine.low %v2888_v29, %v2904_v36  ;;  %v2844_v44 = vcombine.low %v2820_v37, %v2836_v38  ;;  %v3150_v29 = vld [vmem:[%s4895_s6 + $0x28] sm:$0xff]  ;;  %v3151_v37 = vld [vmem:[%s4895_s6 + $0x30] sm:$0xff]  ;;  %v3152_v38 = vld [vmem:[%s4895_s6 + $0x38] sm:$0xff] }
 0x4a1   :  { %v2847_v35 = vcombine.high %v2827_v39, %v2843_v40  ;;  %v2846_v46 = vcombine.low %v2827_v39, %v2843_v40  ;;  %v2914_v47 = vcombine.low %v2895_v41, %v2911_v18  ;;  %v2915_v48 = vcombine.high %v2895_v41, %v2911_v18  ;;  %v3153_v40 = vld [vmem:[%s4895_s6 + $0x40] sm:$0xff]  ;;  %v3154_v41 = vld [vmem:[%s4895_s6 + $0x48] sm:$0xff] }
 0x4a2   :  { %2920 = vrot.lane.b32.xlu0 %v2913_v19, %s4080_s5  ;;  %2918 = vrot.lane.b32.xlu1 %v2845_v42, %s4080_s5  ;;  %v3081_v3 = vrot.slane %v3067_v2, %v4192_v22  ;;  %v3099_v9 = vcombine.low %v3091_v4, %v3098_v30  ;;  %v3932_v28 = vpack.c.bf16 %v3146_v25, %v3145_v24 }
 0x4a3   :  { %v3938_v33 = vpack.c.bf16 %v3148_v32, %v3147_v26  ;;  %v3944_v36 = vpack.c.bf16 %v3150_v29, %v3149_v34  ;;  %v3950_v39 = vpack.c.bf16 %v3152_v38, %v3151_v37  ;;  %v3956_v18 = vpack.c.bf16 %v3154_v41, %v3153_v40 }
 0x4a4   :  { %v3082_v11 = vcombine.low %v3074_v6, %v3081_v3  ;;  %3934 = vmatprep.subr.msk.bf16.mxu1 %vm4152_vm1, %v3932_v28  ;;  %v3351_v6 = vld [vmem:[%s4896_s7] sm:$0xff]  ;;  %v3352_v3 = vld [vmem:[%s4896_s7 + $0x8] sm:$0xff] }
 0x4a5   :  { %3937 = vmatpush3.bf16.xpose.msk.msra.mxu1 %vm4152_vm1, %v3932_v28 }
 0x4a6   :  { %2934 = vrot.lane.b32.xlu0 %v2847_v35, %s4081_s15  ;;  %2926 = vrot.lane.b32.xlu1 %v2846_v46, %s4082_s16 }
 0x4a7   :  { %3940 = vmatprep.subr.msk.bf16.mxu1 %vm4152_vm1, %v3938_v33 }
 0x4aa   :  { %2928 = vrot.lane.b32.xlu1 %v2914_v47, %s4082_s16 }
 0x4ad   :  { %3943 = vmatpush3.bf16.xpose.msk.msra.mxu1 %vm4152_vm1, %v3938_v33 }
 0x4ae   :  { %2936 = vrot.lane.b32.xlu1 %v2915_v48, %s4081_s15  ;;  %3946 = vmatprep.subr.msk.bf16.mxu1 %vm4152_vm1, %v3944_v36 }
 0x4b5   :  { %3949 = vmatpush3.bf16.xpose.msk.msra.mxu1 %vm4152_vm1, %v3944_v36 }
 0x4b6   :  { %3952 = vmatprep.subr.msk.bf16.mxu1 %vm4152_vm1, %v3950_v39 }
 0x4bd   :  { %3955 = vmatpush3.bf16.xpose.msk.msra.mxu1 %vm4152_vm1, %v3950_v39 }
 0x4be   :  { %3958 = vmatprep.subr.msk.bf16.mxu1 %vm4152_vm1, %v3956_v18 }
 0x4c5   :  { %3961 = vmatpush3.bf16.xpose.msk.msra.mxu1 %vm4152_vm1, %v3956_v18 }
 0x514   :  { %v2921_v49 = vpop.permute.xlu0 %2920  ;;  %v2919_v50 = vpop.permute.xlu1 %2918 }
 0x515   :  { %v2940_v45 = vsel %vm1363_vm3, %v2844_v44, %v2919_v50  ;;  %v2941_v17 = vsel %vm1363_vm3, %v2912_v43, %v2921_v49 }
 0x518   :  { %v2935_v52 = vpop.permute.xlu0 %2934  ;;  %v2927_v51 = vpop.permute.xlu1 %2926 }
 0x519   :  { %v2943_v53 = vsel %vm2942_vm4, %v2940_v45, %v2927_v51  ;;  %v3155_v45 = vld [vmem:[%s4895_s6 + $0x50] sm:$0xff] }
 0x51a   :  { %v2946_v54 = vsel %vm2945_vm5, %v2943_v53, %v2935_v52  ;;  %v3156_v52 = vld [vmem:[%s4895_s6 + $0x58] sm:$0xff]  ;;  %v3157_v53 = vld [vmem:[%s4895_s6 + $0x60] sm:$0xff] }
 0x51b   :  { %3835 = vmatprep.mubr.msk.f32.mxu0 %vm111_vm0, %v2946_v54  ;;  %v3962_v51 = vpack.c.bf16 %v3156_v52, %v3155_v45  ;;  %v3158_v54 = vld [vmem:[%s4895_s6 + $0x68] sm:$0xff] }
 0x51c   :  { %v2929_v55 = vpop.permute.xlu1 %2928 }
 0x51d   :  { %v2944_v56 = vsel %vm2942_vm4, %v2941_v17, %v2929_v55  ;;  %3964 = vmatprep.subr.msk.bf16.mxu1 %vm4152_vm1, %v3962_v51  ;;  %v3968_v55 = vpack.c.bf16 %v3158_v54, %v3157_v53  ;;  %v3159_v17 = vld [vmem:[%s4895_s6 + $0x70] sm:$0xff] }
 0x51e   :  { %3967 = vmatpush3.bf16.xpose.msk.msra.mxu1 %vm4152_vm1, %v3962_v51 }
 0x51f   :  { %3970 = vmatprep.subr.msk.bf16.mxu1 %vm4152_vm1, %v3968_v55 }
 0x520   :  { %v2937_v58 = vpop.permute.xlu1 %2936 }
 0x521   :  { %v2947_v60 = vsel %vm2945_vm5, %v2944_v56, %v2937_v58  ;;  %v3160_v56 = vld [vmem:[%s4895_s6 + $0x78] sm:$0xff] }
 0x522   :  { %3836 = vmatmul.mubr.msk.f32.vlgmr.msra.gmra.mrb[18].mxu0 %vm111_vm0, %v2947_v60  ;;  %v3974_v58 = vpack.c.bf16 %v3160_v56, %v3159_v17 }
 0x526   :  { %3973 = vmatpush3.bf16.xpose.msk.msra.mxu1 %vm4152_vm1, %v3968_v55 }
 0x527   :  { %3976 = vmatprep.subr.msk.bf16.mxu1 %vm4152_vm1, %v3974_v58 }
 0x52e   :  { %3979 = vmatpush3.bf16.xpose.msk.msra.mxu1 %vm4152_vm1, %v3974_v58 }
 0x5f5   :  { %v3837_v10 = vpop.f32.mrb[18].mxu0 }
 0x5f6   :  { %v3047_v27 = vadd.f32 %v3837_v10, %v3603_v8  ;;  %v3041_v13 = vpop.f32.mrb[19].mxu0  ;;  %v3354_v10 = vld [vmem:[%s4896_s7 + $0x18] sm:$0xff] }
 0x5f7   :  { %v3042_v14 = vadd.f32 %v3603_v8, %v3041_v13  ;;  %v3980_v8 = vpack.c.bf16 %v3352_v3, %v3351_v6  ;;  %v3631_v6 = vld [vmem:[%s4897_s8 + $0x8] ss:$0 sm:$0xff] }
 0x5f8   :  { %v3103_v15 = vadd.f32 %v3099_v9, %v3047_v27  ;;  %v3353_v9 = vld [vmem:[%s4896_s7 + $0x10] sm:$0xff]  ;;  %v3612_v27 = vld [vmem:[%s4898_s9] ss:$0 sm:$0xff] }
 0x5f9   :  { %v3102_v16 = vadd.f32 %v3082_v11, %v3042_v14  ;;  %3981 = vmatprep.subr.bf16.mxu0 %v3980_v8  ;;  %v3984_v11 = vpack.c.bf16 %v3354_v10, %v3353_v9 }
 0x5fa   :  { %v3109_v21 = vsel %vm111_vm0, %v3103_v15, 0.0  ;;  %3983 = vmatpush3.bf16.xpose.msra.mxu0 %v3980_v8 }
 0x5fb   :  { %3110 = vadd.xlane.f32.xlu1 %v3109_v21  ;;  %v3106_v23 = vsel %vm111_vm0, %v3102_v16, 0.0  ;;  %3985 = vmatprep.subr.bf16.mxu0 %v3984_v11 }
 0x5fc   :  { %3107 = vadd.xlane.f32.xlu0 %v3106_v23 }
 0x602   :  { %3987 = vmatpush3.bf16.xpose.msra.mxu0 %v3984_v11 }
 0x688   :  { %v3111_v19 = vpop.xlane.xlu1 %3110 }
 0x689   :  { %v3114_v42 = vmul.f32 0.03125, %v3111_v19  ;;  %v3108_v43 = vpop.xlane.xlu0 %3107 }
 0x68a   :  { %v3113_v44 = vmul.f32 0.03125, %v3108_v43 }
 0x68b   :  { %v3116_v35 = vsub.f32 %v3103_v15, %v3114_v42 }
 0x68c   :  { %v3115_v46 = vsub.f32 %v3102_v16, %v3113_v44 }
 0x68d   :  { %v3118_v49 = vmul.f32 %v3116_v35, %v3116_v35 }
 0x68e   :  { %v3117_v47 = vmul.f32 %v3115_v46, %v3115_v46 }
 0x68f   :  { %v3122_v50 = vsel %vm111_vm0, %v3118_v49, 0.0 }
 0x690   :  { %v3119_v48 = vsel %vm111_vm0, %v3117_v47, 0.0 }
 0x691   :  { %3120 = vadd.xlane.f32.xlu0 %v3119_v48 }
 0x695   :  { %3123 = vadd.xlane.f32.xlu0 %v3122_v50 }
 0x71e   :  { %v3121_v60 = vpop.xlane.xlu0 %3120 }
 0x71f   :  { %v3125_v59 = vmul.f32 0.03125, %v3121_v60 }
 0x721   :  { %v3127_v7 = vadd.f32 1e-05, %v3125_v59 }
 0x722   :  { %v3124_v1 = vpop.xlane.xlu0 %3123 }
 0x723   :  { %4033 = vrsqrt.f32 %v3127_v7  ;;  %v3126_v61 = vmul.f32 0.03125, %v3124_v1 }
 0x725   :  { %v3128_v62 = vadd.f32 1e-05, %v3126_v61 }
 0x727   :  { %4035 = vrsqrt.f32 %v3128_v62 }
 0x72d   :  { %v4034_v63 = vpop.eup %4033 }
 0x72e   :  { %v3131_v0 = vmul.f32 %v4034_v63, %v3115_v46 }
 0x730   :  { %v3137_v5 = vmul.f32 %v3610_v20, %v3131_v0 }
 0x731   :  { %v4036_v12 = vpop.eup %4035 }
 0x732   :  { %v3132_v57 = vmul.f32 %v4036_v12, %v3116_v35  ;;  %v4827_v2 = vadd.f32 %v3611_v31, %v3137_v5 }
 0x734   :  { %v3138_v4 = vmul.f32 %v3610_v20, %v3132_v57  ;;  %3870 = vmatprep.mubr.msk.f32.mxu1 %vm111_vm0, %v4827_v2 }
 0x736   :  { %v4831_v30 = vadd.f32 %v3611_v31, %v3138_v4 }
 0x738   :  { %3871 = vmatmul.mubr.msk.f32.vlgmr.msra.gmra.mrb[20].mxu1 %vm111_vm0, %v4831_v30 }
 0x80b   :  { %v3872_v13 = vpop.f32.mrb[20].mxu1 }
 0x80c   :  { %v3294_v14 = vadd.f32 %v3872_v13, %v3612_v27  ;;  %v3288_v15 = vpop.f32.mrb[21].mxu1 }
 0x80d   :  { %v3289_v16 = vadd.f32 %v3612_v27, %v3288_v15 }
 0x80e   :  { %v3300_v21 = vmul.f32 0.70710677, %v3294_v14  ;;  %v3298_v12 = vmul.f32 0.5, %v3294_v14 }
 0x80f   :  { %v3299_v23 = vmul.f32 0.70710677, %v3289_v16  ;;  %v3297_v31 = vmul.f32 0.5, %v3289_v16 }
 0x810   :  { %v3302_v24 = vand.u32 2147483647, %v3300_v21  ;;  %vm3342_vm6 = vcmp.ge.f32.partialorder %v3300_v21, 0.0 }
 0x811   :  { %v3301_v25 = vand.u32 2147483647, %v3299_v23  ;;  %vm3341_vm7 = vcmp.ge.f32.partialorder %v3299_v23, 0.0 }
 0x812   :  { %v3304_v26 = vmul.f32 0.3275911, %v3302_v24  ;;  %v3330_v34 = vsub.f32 0.0, %v3302_v24 }
 0x813   :  { %v3303_v28 = vmul.f32 0.3275911, %v3301_v25  ;;  %v3329_v29 = vsub.f32 0.0, %v3301_v25 }
 0x814   :  { %v3306_v32 = vadd.f32 1.0, %v3304_v26  ;;  %v3332_v37 = vmul.f32 %v3330_v34, %v3302_v24 }
 0x815   :  { %v3305_v33 = vadd.f32 1.0, %v3303_v28  ;;  %v3331_v40 = vmul.f32 %v3329_v29, %v3301_v25 }
 0x816   :  { %4037 = vrcp.f32 %v3306_v32  ;;  %v3335_v19 = vmul.f32 1.442695, %v3332_v37 }
 0x817   :  { %4039 = vrcp.f32 %v3305_v33  ;;  %v3333_v44 = vmul.f32 1.442695, %v3331_v40 }
 0x818   :  { %4041 = vpow2.f32 %v3335_v19 }
 0x819   :  { %4043 = vpow2.f32 %v3333_v44 }
 0x820   :  { %v4038_v36 = vpop.eup %4037 }
 0x821   :  { %v4040_v38 = vpop.eup %4039  ;;  %v3312_v39 = vmul.f32 1.0614054, %v4038_v36 }
 0x822   :  { %v3311_v41 = vmul.f32 1.0614054, %v4040_v38  ;;  %v4042_v17 = vpop.eup %4041 }
 0x823   :  { %v3314_v18 = vadd.f32 -1.4531521, %v3312_v39  ;;  %v4044_v58 = vpop.eup %4043  ;;  %v3632_v39 = vld [vmem:[%s4897_s8 + $0x6] ss:$0 sm:$0xff] }
 0x824   :  { %v3313_v42 = vadd.f32 -1.4531521, %v3311_v41 }
 0x825   :  { %v3316_v43 = vmul.f32 %v4038_v36, %v3314_v18  ;;  %v3633_v18 = vld [vmem:[%s4897_s8 + $0x7] ss:$0 sm:$0xff]  ;;  %s4049_s8 = scalar_lea.vmem %s3536_s28, 256 }
 0x826   :  { %v3315_v35 = vmul.f32 %v4040_v38, %v3313_v42  ;;  %p4050_p0 = scmp.ne.s32.totalorder %s3536_s28, %s4049_s8  ;;  %p4055_p2 = scmp.lt.s32.totalorder %s4049_s8, %s4049_s8 }
 0x827   :  { %v3318_v46 = vadd.f32 1.4214138, %v3316_v43 }
 0x828   :  { %v3317_v47 = vadd.f32 1.4214138, %v3315_v35  ;;  %p4056_p3 = por %p4055_p2, %p4054_p1 }
 0x829   :  { %v3320_v48 = vmul.f32 %v4038_v36, %v3318_v46 }
 0x82a   :  { %v3319_v49 = vmul.f32 %v4040_v38, %v3317_v47  ;;  %p4057_p4 = pnand %p4056_p3, %p4050_p0 }
 0x82b   :  { %v3322_v50 = vadd.f32 -0.28449672, %v3320_v48 }
 0x82c   :  { %v3321_v45 = vadd.f32 -0.28449672, %v3319_v49 }
 0x82d   :  { %v3324_v52 = vmul.f32 %v4038_v36, %v3322_v50 }
 0x82e   :  { %v3323_v51 = vmul.f32 %v4040_v38, %v3321_v45 }
 0x82f   :  { %v3326_v53 = vadd.f32 0.2548296, %v3324_v52 }
 0x830   :  { %v3325_v54 = vadd.f32 0.2548296, %v3323_v51 }
 0x831   :  { %v3328_v55 = vmul.f32 %v4038_v36, %v3326_v53 }
 0x832   :  { %v3327_v56 = vmul.f32 %v4040_v38, %v3325_v54 }
 0x833   :  { %v3338_v60 = vmul.f32 %v4042_v17, %v3328_v55 }
 0x834   :  { %v3337_v59 = vmul.f32 %v4044_v58, %v3327_v56 }
 0x835   :  { %v3340_v7 = vsub.f32 1.0, %v3338_v60 }
 0x836   :  { %v3339_v1 = vsub.f32 1.0, %v3337_v59 }
 0x837   :  { %v3344_v61 = vsub.f32 0.0, %v3340_v7 }
 0x838   :  { %v3343_v62 = vsub.f32 0.0, %v3339_v1 }
 0x839   :  { %v3346_v63 = vsel %vm3342_vm6, %v3340_v7, %v3344_v61 }
 0x83a   :  { %v3348_v20 = vadd.f32 1.0, %v3346_v63  ;;  %v3345_v0 = vsel %vm3341_vm7, %v3339_v1, %v3343_v62 }
 0x83b   :  { %v3347_v5 = vadd.f32 1.0, %v3345_v0 }
 0x83c   :  { %v3350_v4 = vmul.f32 %v3348_v20, %v3298_v12 }
 0x83d   :  { %v3349_v57 = vmul.f32 %v3347_v5, %v3297_v31 }
 0x83f   :  { %3881 = vmatprep.mubr.f32.mxu0 %v3349_v57 }
 0x840   :  { %3882 = vmatmul.mubr.f32.vlgmr.msra.gmra.mrb[20].mxu0 %v3350_v4 }
 0x913   :  { %v3883_v3 = vpop.f32.mrb[20].mxu0 }
 0x914   :  { %v3432_v8 = vadd.f32 %v3883_v3, %v3631_v6  ;;  %v3426_v9 = vpop.f32.mrb[21].mxu0 }
 0x915   :  { %v3427_v10 = vadd.f32 %v3631_v6, %v3426_v9 }
 0x916   :  { %v3436_v11 = vadd.f32 %v3432_v8, %v4831_v30 }
 0x917   :  { %v3435_v27 = vadd.f32 %v3427_v10, %v4827_v2 }
 0x918   :  { %v3442_v13 = vsel %vm111_vm0, %v3436_v11, 0.0 }
 0x919   :  { %3443 = vadd.xlane.f32.xlu0 %v3442_v13  ;;  %v3439_v14 = vsel %vm111_vm0, %v3435_v27, 0.0 }
 0x91a   :  { %3440 = vadd.xlane.f32.xlu1 %v3439_v14 }
 0x9a6   :  { %v3444_v15 = vpop.xlane.xlu0 %3443 }
 0x9a7   :  { %v3446_v16 = vmul.f32 0.03125, %v3444_v15  ;;  %v3441_v21 = vpop.xlane.xlu1 %3440 }
 0x9a8   :  { %v3445_v23 = vmul.f32 0.03125, %v3441_v21 }
 0x9a9   :  { %v3448_v24 = vsub.f32 %v3436_v11, %v3446_v16 }
 0x9aa   :  { %v3447_v25 = vsub.f32 %v3435_v27, %v3445_v23 }
 0x9ab   :  { %v3450_v26 = vmul.f32 %v3448_v24, %v3448_v24 }
 0x9ac   :  { %v3449_v28 = vmul.f32 %v3447_v25, %v3447_v25 }
 0x9ad   :  { %v3454_v32 = vsel %vm111_vm0, %v3450_v26, 0.0 }
 0x9ae   :  { %3455 = vadd.xlane.f32.xlu0 %v3454_v32  ;;  %v3451_v30 = vsel %vm111_vm0, %v3449_v28, 0.0 }
 0x9af   :  { %3452 = vadd.xlane.f32.xlu1 %v3451_v30 }
 0xa3b   :  { %v3456_v2 = vpop.xlane.xlu0 %3455 }
 0xa3c   :  { %v3458_v33 = vmul.f32 0.03125, %v3456_v2  ;;  %v3453_v34 = vpop.xlane.xlu1 %3452 }
 0xa3d   :  { %v3457_v29 = vmul.f32 0.03125, %v3453_v34 }
 0xa3e   :  { %v3460_v36 = vadd.f32 1e-05, %v3458_v33 }
 0xa3f   :  { %v3459_v37 = vadd.f32 1e-05, %v3457_v29 }
 0xa40   :  { %4045 = vrsqrt.f32 %v3460_v36 }
 0xa41   :  { %4047 = vrsqrt.f32 %v3459_v37 }
 0xa4a   :  { %v4046_v38 = vpop.eup %4045 }
 0xa4b   :  { %v4048_v40 = vpop.eup %4047  ;;  %v3464_v41 = vmul.f32 %v4046_v38, %v3448_v24 }
 0xa4c   :  { %v3463_v19 = vmul.f32 %v4048_v40, %v3447_v25 }
 0xa4d   :  { %v3470_v42 = vmul.f32 %v3632_v39, %v3464_v41 }
 0xa4e   :  { %v3469_v43 = vmul.f32 %v3632_v39, %v3463_v19 }
 0xa4f   :  { %v3476_v44 = vadd.f32 %v3633_v18, %v3470_v42 }
 0xa50   :  { %v3475_v35 = vadd.f32 %v3633_v18, %v3469_v43 }
 0xa51   :  { %v3496_v46 = vcombine.high %v3476_v44, %v3476_v44  ;;  %v3503_v47 = vrot.slane %v3476_v44, %v4192_v22 }
 0xa52   :  { %v3479_v48 = vcombine.high %v3475_v35, %v3475_v35  ;;  %v3486_v49 = vrot.slane %v3475_v35, %v4192_v22 }
 0xa53   :  { %v3510_v50 = vrot.slane %v3496_v46, %v4192_v22  ;;  %v3511_v45 = vcombine.high %v3503_v47, %v3503_v47  ;;  %3526 = vst.msk [vmem:[#allocation2 + $0x8] sm:$0x3] %vm3521_vm8, %v3503_v47 }
 0xa54   :  { %v3493_v52 = vrot.slane %v3479_v48, %v4192_v22  ;;  %v3494_v51 = vcombine.high %v3486_v49, %v3486_v49  ;;  %3522 = vst.msk [vmem:[#allocation2] sm:$0x3] %vm3521_vm8, %v3486_v49 }
 0xa55   :  { %v3512_v53 = vcombine.high %v3510_v50, %v3510_v50  ;;  %3527 = vst.msk [vmem:[#allocation2 + $0xa] sm:$0x3] %vm3521_vm8, %v3511_v45  ;;  %3528 = vst.msk [vmem:[#allocation2 + $0xc] sm:$0x3] %vm3521_vm8, %v3510_v50 }
 0xa56   :  { %v3495_v54 = vcombine.high %v3493_v52, %v3493_v52  ;;  %3523 = vst.msk [vmem:[#allocation2 + $0x2] sm:$0x3] %vm3521_vm8, %v3494_v51  ;;  %3524 = vst.msk [vmem:[#allocation2 + $0x4] sm:$0x3] %vm3521_vm8, %v3493_v52 }
 0xa57   :  { %3529 = vst.msk [vmem:[#allocation2 + $0xe] sm:$0x3] %vm3521_vm8, %v3512_v53 }
 0xa58   :  { %3525 = vst.msk [vmem:[#allocation2 + $0x6] sm:$0x3] %vm3521_vm8, %v3495_v54 }
 0xa59   :  { %4060 = shalt.err (!%p4057_p4)
}
 0xa5a   :  { %s4061_s11 = scalar_lea.hbm %s4899_s10, 256 }
 0xa5b   :  { %p4062_p5 = scmp.ne.s32.totalorder %s4899_s10, %s4061_s11  ;;  %p4065_p6 = scmp.lt.u32.totalorder %s4061_s11, %s4899_s10 }
 0xa5d   :  { %p4067_p7 = pnand %p4065_p6, %p4062_p5 }
 0xa5f   :  { %4070 = shalt.err (!%p4067_p7)
}
 0xa60   :  { %s4084_s15 = smov 32   ;;  %s4085_s16 = smov 2  }
 0xa61   :  { %3541 = dma.vmem_to_hbm [thread:$0]  %s3536_s28, 256, %s4899_s10, [#allocation3], %s4084_s15, %s4084_s15, %s4085_s16  }
 0xa62   :  { %4071 = dma.done.wait [#allocation3], 256  }
 0xa63   :  { %4072 = vsyncadd [#allocation3], 4294967040 }
 0xa64   :  { %3545 = vsyncpa [#allocation3], 1 }

</bundles_post_ra>
